<compile_context>
chip_gen: v5e
topology: v5e:2x2
jax: 0.10.0
libtpu: 0.0.40
codegen_flags: <defaults>
</compile_context>

<pallas_src>
import functools

import jax
import jax.numpy as jnp
from jax.experimental import pallas as pl
from jax.experimental.pallas import tpu as pltpu

INPUT_SIZE = 784
HIDDEN_SIZE = 500
NUM_CLASSES = 10

# Lane-aligned (multiple-of-128) padded output dims; x stays unpadded at 784.
HID_PAD = 512    # 500 -> 4 * 128
OUT_PAD = 128    # 10  -> 1 * 128

TB = 512         # batch tile: amortizes grid-step overhead, M>=256 for v6e/v7x MXU


def mlp_kernel(x_ref, w1_ref, b1_ref, w2_ref, b2_ref, o_ref):
    # In-kernel f32 -> bf16 cast of the streamed x tile (VPU filler under MXU).
    x = x_ref[...].astype(jnp.bfloat16)
    # fc1: (tb, 784) bf16 @ (784, 512) bf16 -> f32 accum on MXU
    h = jnp.dot(x, w1_ref[...], preferred_element_type=jnp.float32)
    # bias + ReLU: VPU elementwise, effectively free under the MXU slots
    h = jnp.maximum(h + b1_ref[...], 0.0)
    # fc2: (tb, 512) bf16 @ (512, 128) bf16 -> f32 accum
    out = jnp.dot(h.astype(jnp.bfloat16), w2_ref[...],
                  preferred_element_type=jnp.float32)
    o_ref[...] = (out + b2_ref[...]).astype(o_ref.dtype)   # bf16 writeback


def _pad_to(a, shape):
    return jnp.pad(a, [(0, t - s) for s, t in zip(a.shape, shape)])


@functools.partial(jax.jit, static_argnames=("tb",))
def mlp_forward(x, w1, b1, w2, b2, tb=TB):
    """x: (B, 784) f32; w1: (784, 500); b1: (1, 500); w2: (500, 10); b2: (1, 10)."""
    B = x.shape[0]
    # Clamp batch tile for small batches (keep it a multiple of 8 sublanes).
    tb = max(8, min(tb, pl.cdiv(B, 8) * 8))
    b_pad = pl.cdiv(B, tb) * tb
    grid = (b_pad // tb,)

    # x: f32, feature dim unpadded; only pad the batch if needed.
    xp = _pad_to(x, (b_pad, INPUT_SIZE)) if b_pad != B else x
    # One-time, weight-sized pad/cast to lane-aligned bf16 (negligible traffic).
    w1p = _pad_to(w1, (INPUT_SIZE, HID_PAD)).astype(jnp.bfloat16)
    b1p = _pad_to(b1, (1, HID_PAD)).astype(jnp.float32)
    w2p = _pad_to(w2, (HID_PAD, OUT_PAD)).astype(jnp.bfloat16)
    b2p = _pad_to(b2, (1, OUT_PAD)).astype(jnp.float32)

    flops = 2 * b_pad * (INPUT_SIZE * HID_PAD + HID_PAD * OUT_PAD)
    bytes_accessed = (
        b_pad * INPUT_SIZE * 4        # x (f32, cast in kernel)
        + INPUT_SIZE * HID_PAD * 2    # w1 (bf16)
        + HID_PAD * 4                 # b1 (f32)
        + HID_PAD * OUT_PAD * 2       # w2 (bf16)
        + OUT_PAD * 4                 # b2 (f32)
        + b_pad * OUT_PAD * 2         # out (bf16)
    )

    out = pl.pallas_call(
        mlp_kernel,
        out_shape=jax.ShapeDtypeStruct((b_pad, OUT_PAD), jnp.bfloat16),
        grid_spec=pltpu.PrefetchScalarGridSpec(
            num_scalar_prefetch=0,
            grid=grid,
            in_specs=[
                pl.BlockSpec((tb, INPUT_SIZE), lambda i: (i, 0)),       # x: streams
                pl.BlockSpec((INPUT_SIZE, HID_PAD), lambda i: (0, 0)),  # w1: resident
                pl.BlockSpec((1, HID_PAD), lambda i: (0, 0)),           # b1: resident
                pl.BlockSpec((HID_PAD, OUT_PAD), lambda i: (0, 0)),     # w2: resident
                pl.BlockSpec((1, OUT_PAD), lambda i: (0, 0)),           # b2: resident
            ],
            out_specs=pl.BlockSpec((tb, OUT_PAD), lambda i: (i, 0)),
        ),
        compiler_params=pltpu.CompilerParams(
            dimension_semantics=("parallel",),
        ),
        cost_estimate=pl.CostEstimate(
            flops=flops, transcendentals=0, bytes_accessed=bytes_accessed),
    )(xp, w1p, b1p, w2p, b2p)

    # Slice away batch padding and zero-padded logit columns; f32 for parity
    # with the PyTorch module's output dtype (tiny (B, 10) op).
    return out[:B, :NUM_CLASSES].astype(jnp.float32)


def init_params(key):
    # Deterministic synthetic init (shapes match nn.Linear(784,500)/nn.Linear(500,10)),
    # stored transposed relative to PyTorch: (in, out) instead of (out, in).
    k1, k2, k3, k4 = jax.random.split(key, 4)
    bound1 = 1.0 / jnp.sqrt(INPUT_SIZE)
    bound2 = 1.0 / jnp.sqrt(HIDDEN_SIZE)
    w1 = jax.random.uniform(k1, (INPUT_SIZE, HIDDEN_SIZE), jnp.float32, -bound1, bound1)
    b1 = jax.random.uniform(k2, (1, HIDDEN_SIZE), jnp.float32, -bound1, bound1)
    w2 = jax.random.uniform(k3, (HIDDEN_SIZE, NUM_CLASSES), jnp.float32, -bound2, bound2)
    b2 = jax.random.uniform(k4, (1, NUM_CLASSES), jnp.float32, -bound2, bound2)
    return w1, b1, w2, b2


if __name__ == "__main__":
    key = jax.random.PRNGKey(0)
    k_x, k_p = jax.random.split(key)
    B = 8
    x = jax.random.normal(k_x, (B, INPUT_SIZE), jnp.float32)
    w1, b1, w2, b2 = init_params(k_p)

    out = mlp_forward(x, w1, b1, w2, b2)
    out = jax.block_until_ready(out)
    assert out.shape == (B, NUM_CLASSES)

    # Pure-JAX f32 reference (kernel uses bf16 operands, f32 MXU accumulation,
    # bf16 writeback -> tolerance covers the bf16 rounding).
    ref = jnp.maximum(x @ w1 + b1, 0.0) @ w2 + b2
    assert jnp.allclose(out, ref, atol=3e-2, rtol=3e-2), (
        float(jnp.max(jnp.abs(out - ref))))

    print("KERNEL_OK")
</pallas_src>

<mosaic_0001>
module attributes {stable_mosaic.version = 11 : i64} {
  func.func @mlp_kernel(%arg0: i32, %arg1: memref<8x784xf32, #tpu.memory_space<vmem>>, %arg2: memref<784x512xbf16, #tpu.memory_space<vmem>>, %arg3: memref<1x512xf32, #tpu.memory_space<vmem>>, %arg4: memref<512x128xbf16, #tpu.memory_space<vmem>>, %arg5: memref<1x128xf32, #tpu.memory_space<vmem>>, %arg6: memref<8x128xbf16, #tpu.memory_space<vmem>>) attributes {dimension_semantics = [#tpu.dimension_semantics<parallel>], iteration_bounds = array<i64: 1>, scalar_prefetch = 0 : i64, scratch_operands = 0 : i64, tpu.core_type = #tpu.core_type<tc>, window_params = [{transform_indices = @transform_0, window_bounds = array<i64: 8, 784>}, {pipeline_mode = #tpu.pipeline_mode<synchronous>, transform_indices = @transform_1, window_bounds = array<i64: 784, 512>}, {pipeline_mode = #tpu.pipeline_mode<synchronous>, transform_indices = @transform_2, window_bounds = array<i64: 1, 512>}, {pipeline_mode = #tpu.pipeline_mode<synchronous>, transform_indices = @transform_3, window_bounds = array<i64: 512, 128>}, {pipeline_mode = #tpu.pipeline_mode<synchronous>, transform_indices = @transform_4, window_bounds = array<i64: 1, 128>}, {transform_indices = @transform_5, window_bounds = array<i64: 8, 128>}]} {
    %c0 = arith.constant 0 : index
    %c0_0 = arith.constant 0 : index
    %0 = vector.load %arg1[%c0, %c0_0] : memref<8x784xf32, #tpu.memory_space<vmem>>, vector<8x784xf32>
    %1 = arith.truncf %0 : vector<8x784xf32> to vector<8x784xbf16>
    %c0_1 = arith.constant 0 : index
    %c0_2 = arith.constant 0 : index
    %2 = vector.load %arg2[%c0_1, %c0_2] : memref<784x512xbf16, #tpu.memory_space<vmem>>, vector<784x512xbf16>
    %cst = arith.constant dense<0.000000e+00> : vector<8x512xf32>
    %3 = tpu.matmul %1, %2, %cst {dimension_numbers = #tpu.dot_dimension_numbers<[1], [0], [0], [1], [0, 0, 1, 1], [], []>} : vector<8x784xbf16>, vector<784x512xbf16>, vector<8x512xf32> -> vector<8x512xf32>
    %c0_3 = arith.constant 0 : index
    %c0_4 = arith.constant 0 : index
    %4 = vector.load %arg3[%c0_3, %c0_4] : memref<1x512xf32, #tpu.memory_space<vmem>>, vector<1x512xf32>
    %5 = vector.broadcast %4 : vector<1x512xf32> to vector<8x512xf32>
    %6 = arith.addf %3, %5 : vector<8x512xf32>
    %cst_5 = arith.constant 0.000000e+00 : f32
    %7 = vector.broadcast %cst_5 : f32 to vector<8x512xf32>
    %8 = arith.maximumf %6, %7 : vector<8x512xf32>
    %9 = arith.truncf %8 : vector<8x512xf32> to vector<8x512xbf16>
    %c0_6 = arith.constant 0 : index
    %c0_7 = arith.constant 0 : index
    %10 = vector.load %arg4[%c0_6, %c0_7] : memref<512x128xbf16, #tpu.memory_space<vmem>>, vector<512x128xbf16>
    %cst_8 = arith.constant dense<0.000000e+00> : vector<8x128xf32>
    %11 = tpu.matmul %9, %10, %cst_8 {dimension_numbers = #tpu.dot_dimension_numbers<[1], [0], [0], [1], [0, 0, 1, 1], [], []>} : vector<8x512xbf16>, vector<512x128xbf16>, vector<8x128xf32> -> vector<8x128xf32>
    %c0_9 = arith.constant 0 : index
    %c0_10 = arith.constant 0 : index
    %12 = vector.load %arg5[%c0_9, %c0_10] : memref<1x128xf32, #tpu.memory_space<vmem>>, vector<1x128xf32>
    %13 = vector.broadcast %12 : vector<1x128xf32> to vector<8x128xf32>
    %14 = arith.addf %11, %13 : vector<8x128xf32>
    %15 = arith.truncf %14 : vector<8x128xf32> to vector<8x128xbf16>
    %c0_11 = arith.constant 0 : index
    %c0_12 = arith.constant 0 : index
    %16 = vector.load %arg6[%c0_11, %c0_12] : memref<8x128xbf16, #tpu.memory_space<vmem>>, vector<8x128xbf16>
    tpu.vector_store %arg6[%c0_11, %c0_12], %15 {strides = array<i32>} : memref<8x128xbf16, #tpu.memory_space<vmem>>, vector<8x128xbf16>,
    return
  }
  func.func @transform_0(%arg0: i32) -> (i32, i32) {
    %c0_i32 = arith.constant 0 : i32
    %c0_i32_0 = arith.constant 0 : i32
    return %arg0, %c0_i32 : i32, i32
  }
  func.func @transform_1(%arg0: i32) -> (i32, i32) {
    %c0_i32 = arith.constant 0 : i32
    %c0_i32_0 = arith.constant 0 : i32
    %c0_i32_1 = arith.constant 0 : i32
    return %c0_i32, %c0_i32_0 : i32, i32
  }
  func.func @transform_2(%arg0: i32) -> (i32, i32) {
    %c0_i32 = arith.constant 0 : i32
    %c0_i32_0 = arith.constant 0 : i32
    %c0_i32_1 = arith.constant 0 : i32
    return %c0_i32, %c0_i32_0 : i32, i32
  }
  func.func @transform_3(%arg0: i32) -> (i32, i32) {
    %c0_i32 = arith.constant 0 : i32
    %c0_i32_0 = arith.constant 0 : i32
    %c0_i32_1 = arith.constant 0 : i32
    return %c0_i32, %c0_i32_0 : i32, i32
  }
  func.func @transform_4(%arg0: i32) -> (i32, i32) {
    %c0_i32 = arith.constant 0 : i32
    %c0_i32_0 = arith.constant 0 : i32
    %c0_i32_1 = arith.constant 0 : i32
    return %c0_i32, %c0_i32_0 : i32, i32
  }
  func.func @transform_5(%arg0: i32) -> (i32, i32) {
    %c0_i32 = arith.constant 0 : i32
    %c0_i32_0 = arith.constant 0 : i32
    return %arg0, %c0_i32 : i32, i32
  }
}

</mosaic_0001>

<bundles_post_ra>
// kernel: mlp_forward.1
= control target key start
LH: loop header
LB: loop body
LE: loop exit
PB: predicated region body
PF: predicated region fallthrough
CT: control target
= control target key end

     0   :  { %vm1221_vm0 = vcmask 130048   ;;  %s4456_s1 = inlined_call_operand.vmem [shape: bf16[784,512], index: 1, kind: input, shape index: {}]   ;;  %s4457_s0 = inlined_call_operand.vmem [shape: f32[8,784], index: 0, kind: input, shape index: {}]   ;;  %s4458_s2 = inlined_call_operand.vmem [shape: f32[1,512], index: 2, kind: input, shape index: {}]   ;;  %s4459_s3 = inlined_call_operand.vmem [shape: bf16[512,128], index: 3, kind: input, shape index: {}]   ;;  %s4460_s4 = inlined_call_operand.vmem [shape: f32[1,128], index: 4, kind: input, shape index: {}]   ;;  %s4461_s5 = inlined_call_operand.vmem [shape: bf16[8,128], index: 5, kind: output, shape index: {}]  }
   0x1   :  { %v2029_v0 = vld [vmem:[%s4456_s1 + $0xe0] sm:$0xf]  ;;  %v2861_v1 = vld [vmem:[%s4456_s1 + $0xec] sm:$0xf0] }
   0x2   :  { %v2157_v2 = vld [vmem:[%s4456_s1 + $0x1e0] sm:$0xf]  ;;  %v2030_v3 = vor.u32 %v2861_v1, %v2029_v0  ;;  %v2893_v4 = vld [vmem:[%s4456_s1 + $0x1ec] sm:$0xf0] }
   0x3   :  { %v2285_v5 = vld [vmem:[%s4456_s1 + $0x2e0] sm:$0xf]  ;;  %v2925_v6 = vld [vmem:[%s4456_s1 + $0x2ec] sm:$0xf0]  ;;  %v2158_v7 = vor.u32 %v2893_v4, %v2157_v2 }
   0x4   :  { %v2286_v8 = vor.u32 %v2925_v6, %v2285_v5  ;;  %v2413_v9 = vld [vmem:[%s4456_s1 + $0x3e0] sm:$0xf]  ;;  %v2957_v10 = vld [vmem:[%s4456_s1 + $0x3ec] sm:$0xf0]  ;;  %1225 = vmatpush.bf16.msra.mxu0 %v2030_v3 }
   0x5   :  { %v2013_v11 = vld [vmem:[%s4456_s1 + $0xc0] sm:$0xf]  ;;  %v2414_v12 = vor.u32 %v2957_v10, %v2413_v9  ;;  %v2857_v13 = vld [vmem:[%s4456_s1 + $0xcc] sm:$0xf0]  ;;  %1238 = vmatpush.bf16.msra.mxu1 %v2158_v7 }
   0x6   :  { %v2141_v14 = vld [vmem:[%s4456_s1 + $0x1c0] sm:$0xf]  ;;  %v2889_v15 = vld [vmem:[%s4456_s1 + $0x1cc] sm:$0xf0]  ;;  %1251 = vmatpush.bf16.msra.mxu2 %v2286_v8  ;;  %v2014_v16 = vor.u32 %v2857_v13, %v2013_v11 }
   0x7   :  { %v2142_v17 = vor.u32 %v2889_v15, %v2141_v14  ;;  %v2269_v18 = vld [vmem:[%s4456_s1 + $0x2c0] sm:$0xf]  ;;  %v2921_v19 = vld [vmem:[%s4456_s1 + $0x2cc] sm:$0xf0]  ;;  %1264 = vmatpush.bf16.msra.mxu3 %v2414_v12 }
   0x8   :  { %v2397_v20 = vld [vmem:[%s4456_s1 + $0x3c0] sm:$0xf]  ;;  %v2270_v21 = vor.u32 %v2921_v19, %v2269_v18  ;;  %v2953_v22 = vld [vmem:[%s4456_s1 + $0x3cc] sm:$0xf0]  ;;  %1226 = vmatpush.bf16.msra.mxu0 %v2014_v16 }
   0x9   :  { %v1997_v23 = vld [vmem:[%s4456_s1 + $0xa0] sm:$0xf]  ;;  %v2853_v24 = vld [vmem:[%s4456_s1 + $0xac] sm:$0xf0]  ;;  %v2398_v25 = vor.u32 %v2953_v22, %v2397_v20  ;;  %1239 = vmatpush.bf16.msra.mxu1 %v2142_v17 }
   0xa   :  { %v2125_v26 = vld [vmem:[%s4456_s1 + $0x1a0] sm:$0xf]  ;;  %v2885_v27 = vld [vmem:[%s4456_s1 + $0x1ac] sm:$0xf0]  ;;  %v1998_v29 = vor.u32 %v2853_v24, %v1997_v23  ;;  %1252 = vmatpush.bf16.msra.mxu2 %v2270_v21 }
   0xb   :  { %v2253_v28 = vld [vmem:[%s4456_s1 + $0x2a0] sm:$0xf]  ;;  %v2917_v30 = vld [vmem:[%s4456_s1 + $0x2ac] sm:$0xf0]  ;;  %v2126_v33 = vor.u32 %v2885_v27, %v2125_v26  ;;  %1265 = vmatpush.bf16.msra.mxu3 %v2398_v25 }
   0xc   :  { %v2381_v31 = vld [vmem:[%s4456_s1 + $0x3a0] sm:$0xf]  ;;  %v2949_v32 = vld [vmem:[%s4456_s1 + $0x3ac] sm:$0xf0]  ;;  %v2254_v34 = vor.u32 %v2917_v30, %v2253_v28  ;;  %1227 = vmatpush.bf16.msra.mxu0 %v1998_v29 }
   0xd   :  { %v1981_v35 = vld [vmem:[%s4456_s1 + $0x80] sm:$0xf]  ;;  %v2849_v36 = vld [vmem:[%s4456_s1 + $0x8c] sm:$0xf0]  ;;  %v2382_v38 = vor.u32 %v2949_v32, %v2381_v31  ;;  %1240 = vmatpush.bf16.msra.mxu1 %v2126_v33  ;;  %v2859_v33 = vld [vmem:[%s4456_s1 + $0xe4] sm:$0xf] }
   0xe   :  { %v2109_v37 = vld [vmem:[%s4456_s1 + $0x180] sm:$0xf]  ;;  %v2881_v39 = vld [vmem:[%s4456_s1 + $0x18c] sm:$0xf0]  ;;  %v1982_v44 = vor.u32 %v2849_v36, %v1981_v35  ;;  %1253 = vmatpush.bf16.msra.mxu2 %v2254_v34  ;;  %v2031_v34 = vld [vmem:[%s4456_s1 + $0xf0] sm:$0xf0] }
   0xf   :  { %v2237_v40 = vld [vmem:[%s4456_s1 + $0x280] sm:$0xf]  ;;  %v2913_v41 = vld [vmem:[%s4456_s1 + $0x28c] sm:$0xf0]  ;;  %v2110_v45 = vor.u32 %v2881_v39, %v2109_v37  ;;  %1266 = vmatpush.bf16.msra.mxu3 %v2382_v38 }
  0x10   :  { %v2365_v42 = vld [vmem:[%s4456_s1 + $0x380] sm:$0xf]  ;;  %v2945_v43 = vld [vmem:[%s4456_s1 + $0x38c] sm:$0xf0]  ;;  %v2238_v46 = vor.u32 %v2913_v41, %v2237_v40  ;;  %1228 = vmatpush.bf16.msra.mxu0 %v1982_v44  ;;  %v2159_v44 = vld [vmem:[%s4456_s1 + $0x1f0] sm:$0xf0] }
  0x11   :  { %v1965_v47 = vld [vmem:[%s4456_s1 + $0x60] sm:$0xf]  ;;  %v2845_v48 = vld [vmem:[%s4456_s1 + $0x6c] sm:$0xf0]  ;;  %v2366_v50 = vor.u32 %v2945_v43, %v2365_v42  ;;  %1241 = vmatpush.bf16.msra.mxu1 %v2110_v45  ;;  %v2891_v43 = vld [vmem:[%s4456_s1 + $0x1e4] sm:$0xf] }
  0x12   :  { %v2093_v49 = vld [vmem:[%s4456_s1 + $0x160] sm:$0xf]  ;;  %v2877_v51 = vld [vmem:[%s4456_s1 + $0x16c] sm:$0xf0]  ;;  %v1966_v56 = vor.u32 %v2845_v48, %v1965_v47  ;;  %1254 = vmatpush.bf16.msra.mxu2 %v2238_v46  ;;  %v24_v45 = vld [vmem:[%s4457_s0 + $0x18] sm:$0xff]  ;;  %v2034_v47 = vor.u32 %v2859_v33, %v2031_v34 }
  0x13   :  { %v2221_v52 = vld [vmem:[%s4456_s1 + $0x260] sm:$0xf]  ;;  %v2909_v53 = vld [vmem:[%s4456_s1 + $0x26c] sm:$0xf0]  ;;  %v2094_v57 = vor.u32 %v2877_v51, %v2093_v49  ;;  %1267 = vmatpush.bf16.msra.mxu3 %v2366_v50 }
  0x14   :  { %v2349_v54 = vld [vmem:[%s4456_s1 + $0x360] sm:$0xf]  ;;  %v2941_v55 = vld [vmem:[%s4456_s1 + $0x36c] sm:$0xf0]  ;;  %v2222_v58 = vor.u32 %v2909_v53, %v2221_v52  ;;  %1229 = vmatpush.bf16.msra.mxu0 %v1966_v56  ;;  %v2855_v53 = vld [vmem:[%s4456_s1 + $0xc4] sm:$0xf] }
  0x15   :  { %v1949_v59 = vld [vmem:[%s4456_s1 + $0x40] sm:$0xf]  ;;  %v2841_v60 = vld [vmem:[%s4456_s1 + $0x4c] sm:$0xf0]  ;;  %v2350_v62 = vor.u32 %v2941_v55, %v2349_v54  ;;  %1242 = vmatpush.bf16.msra.mxu1 %v2094_v57  ;;  %v2015_v54 = vld [vmem:[%s4456_s1 + $0xd0] sm:$0xf0]  ;;  %v3343_v57 = vpack.c.bf16 %v24_v45, %v24_v45 }
  0x16   :  { %v2077_v61 = vld [vmem:[%s4456_s1 + $0x140] sm:$0xf]  ;;  %v2873_v63 = vld [vmem:[%s4456_s1 + $0x14c] sm:$0xf0]  ;;  %v1950_v4 = vor.u32 %v2841_v60, %v1949_v59  ;;  %1255 = vmatpush.bf16.msra.mxu2 %v2222_v58  ;;  %v22_v58 = vld [vmem:[%s4457_s0 + $0x8] sm:$0xff]  ;;  %v2162_v59 = vor.u32 %v2891_v43, %v2159_v44 }
  0x17   :  { %v2205_v0 = vld [vmem:[%s4456_s1 + $0x240] sm:$0xf]  ;;  %v2905_v1 = vld [vmem:[%s4456_s1 + $0x24c] sm:$0xf0]  ;;  %v2078_v5 = vor.u32 %v2873_v63, %v2077_v61  ;;  %1268 = vmatpush.bf16.msra.mxu3 %v2350_v62  ;;  %v2887_v61 = vld [vmem:[%s4456_s1 + $0x1c4] sm:$0xf] }
  0x18   :  { %v2333_v2 = vld [vmem:[%s4456_s1 + $0x340] sm:$0xf]  ;;  %v2937_v3 = vld [vmem:[%s4456_s1 + $0x34c] sm:$0xf0]  ;;  %v2206_v6 = vor.u32 %v2905_v1, %v2205_v0  ;;  %1230 = vmatpush.bf16.msra.mxu0 %v1950_v4  ;;  %v2143_v62 = vld [vmem:[%s4456_s1 + $0x1d0] sm:$0xf0]  ;;  %v2018_v0 = vor.u32 %v2855_v53, %v2015_v54 }
  0x19   :  { %v1933_v7 = vld [vmem:[%s4456_s1 + $0x20] sm:$0xf]  ;;  %v2837_v8 = vld [vmem:[%s4456_s1 + $0x2c] sm:$0xf0]  ;;  %v2334_v10 = vor.u32 %v2937_v3, %v2333_v2  ;;  %1243 = vmatpush.bf16.msra.mxu1 %v2078_v5  ;;  %v2851_v5 = vld [vmem:[%s4456_s1 + $0xa4] sm:$0xf] }
  0x1a   :  { %v2061_v9 = vld [vmem:[%s4456_s1 + $0x120] sm:$0xf]  ;;  %v2869_v11 = vld [vmem:[%s4456_s1 + $0x12c] sm:$0xf0]  ;;  %v1934_v16 = vor.u32 %v2837_v8, %v1933_v7  ;;  %1256 = vmatpush.bf16.msra.mxu2 %v2206_v6  ;;  %v1999_v6 = vld [vmem:[%s4456_s1 + $0xb0] sm:$0xf0]  ;;  %v3374_v7 = vpack.c.bf16 %v22_v58, %v22_v58  ;;  %v2146_v8 = vor.u32 %v2887_v61, %v2143_v62 }
  0x1b   :  { %v2189_v12 = vld [vmem:[%s4456_s1 + $0x220] sm:$0xf]  ;;  %v2901_v13 = vld [vmem:[%s4456_s1 + $0x22c] sm:$0xf0]  ;;  %v2062_v20 = vor.u32 %v2869_v11, %v2061_v9  ;;  %1269 = vmatpush.bf16.msra.mxu3 %v2334_v10  ;;  %v2883_v10 = vld [vmem:[%s4456_s1 + $0x1a4] sm:$0xf] }
  0x1c   :  { %v2317_v14 = vld [vmem:[%s4456_s1 + $0x320] sm:$0xf]  ;;  %v2933_v15 = vld [vmem:[%s4456_s1 + $0x32c] sm:$0xf0]  ;;  %v2190_v21 = vor.u32 %v2901_v13, %v2189_v12  ;;  %1231 = vmatpush.bf16.msra.mxu0 %v1934_v16  ;;  %v2127_v11 = vld [vmem:[%s4456_s1 + $0x1b0] sm:$0xf0]  ;;  %v2002_v13 = vor.u32 %v2851_v5, %v1999_v6 }
  0x1d   :  { %v1917_v17 = vld [vmem:[%s4456_s1] sm:$0xf]  ;;  %v2833_v18 = vld [vmem:[%s4456_s1 + $0xc] sm:$0xf0]  ;;  %v2318_v25 = vor.u32 %v2933_v15, %v2317_v14  ;;  %1244 = vmatpush.bf16.msra.mxu1 %v2062_v20  ;;  %v2130_v20 = vor.u32 %v2883_v10, %v2127_v11  ;;  %v2839_v43 = vld [vmem:[%s4456_s1 + $0x44] sm:$0xf] }
  0x1e   :  { %v2045_v19 = vld [vmem:[%s4456_s1 + $0x100] sm:$0xf]  ;;  %v2865_v22 = vld [vmem:[%s4456_s1 + $0x10c] sm:$0xf0]  ;;  %v1918_v32 = vor.u32 %v2833_v18, %v1917_v17  ;;  %1257 = vmatpush.bf16.msra.mxu2 %v2190_v21  ;;  %v2847_v18 = vld [vmem:[%s4456_s1 + $0x84] sm:$0xf] }
  0x1f   :  { %v2173_v23 = vld [vmem:[%s4456_s1 + $0x200] sm:$0xf]  ;;  %v2897_v24 = vld [vmem:[%s4456_s1 + $0x20c] sm:$0xf0]  ;;  %v2046_v36 = vor.u32 %v2865_v22, %v2045_v19  ;;  %1270 = vmatpush.bf16.msra.mxu3 %v2318_v25  ;;  %v1983_v19 = vld [vmem:[%s4456_s1 + $0x90] sm:$0xf0] }
  0x20   :  { %v2301_v26 = vld [vmem:[%s4456_s1 + $0x300] sm:$0xf]  ;;  %v2929_v27 = vld [vmem:[%s4456_s1 + $0x30c] sm:$0xf0]  ;;  %v2174_v37 = vor.u32 %v2897_v24, %v2173_v23  ;;  %1232 = vmatpush.bf16.msra.mxu0 %v1918_v32  ;;  %v2879_v22 = vld [vmem:[%s4456_s1 + $0x184] sm:$0xf]  ;;  %v1986_v25 = vor.u32 %v2847_v18, %v1983_v19 }
  0x21   :  { %v2541_v28 = vld [vmem:[%s4456_s1 + $0x4e0] sm:$0xf]  ;;  %v2989_v29 = vld [vmem:[%s4456_s1 + $0x4ec] sm:$0xf0]  ;;  %v2302_v41 = vor.u32 %v2929_v27, %v2301_v26  ;;  %1245 = vmatpush.bf16.msra.mxu1 %v2046_v36  ;;  %v2111_v23 = vld [vmem:[%s4456_s1 + $0x190] sm:$0xf0] }
  0x22   :  { %v2669_v30 = vld [vmem:[%s4456_s1 + $0x5e0] sm:$0xf]  ;;  %v3021_v31 = vld [vmem:[%s4456_s1 + $0x5ec] sm:$0xf0]  ;;  %v2542_v42 = vor.u32 %v2989_v29, %v2541_v28  ;;  %1258 = vmatpush.bf16.msra.mxu2 %v2174_v37  ;;  %v2114_v33 = vor.u32 %v2879_v22, %v2111_v23  ;;  %v2095_v36 = vld [vmem:[%s4456_s1 + $0x170] sm:$0xf0] }
  0x23   :  { %v23_v35 = vld [vmem:[%s4457_s0 + $0x10] sm:$0xff]  ;;  %v2685_v38 = vld [vmem:[%s4456_s1 + $0x600] sm:$0xf]  ;;  %v2670_v46 = vor.u32 %v3021_v31, %v2669_v30  ;;  %1271 = vmatpush.bf16.msra.mxu3 %v2302_v41  ;;  %v2843_v30 = vld [vmem:[%s4456_s1 + $0x64] sm:$0xf] }
  0x24   :  { %v3025_v39 = vld [vmem:[%s4456_s1 + $0x60c] sm:$0xf0]  ;;  %v21_v40 = vld [vmem:[%s4457_s0] sm:$0xff]  ;;  %v3330_v51 = vpack.c.bf16 %v23_v35, %v23_v35  ;;  %1277 = vmatpush.bf16.msrb.mxu0 %v2542_v42  ;;  %1246 = vmatmul.bf16.vlgmr.msra.gmra.mxu1 %v3374_v7  ;;  %v1967_v31 = vld [vmem:[%s4456_s1 + $0x70] sm:$0xf0] }
  0x25   :  { %v2525_v48 = vld [vmem:[%s4456_s1 + $0x4c0] sm:$0xf]  ;;  %v2985_v49 = vld [vmem:[%s4456_s1 + $0x4cc] sm:$0xf0]  ;;  %v3341_v55 = vpack.c.bf16 %v21_v40, %v21_v40  ;;  %v2686_v56 = vor.u32 %v3025_v39, %v2685_v38  ;;  %1290 = vmatpush.bf16.msrb.mxu1 %v2670_v46  ;;  %v2875_v35 = vld [vmem:[%s4456_s1 + $0x164] sm:$0xf]  ;;  %v1970_v38 = vor.u32 %v2843_v30, %v1967_v31 }
  0x26   :  { %v2653_v50 = vld [vmem:[%s4456_s1 + $0x5c0] sm:$0xf]  ;;  %v3017_v52 = vld [vmem:[%s4456_s1 + $0x5cc] sm:$0xf0]  ;;  %v2526_v60 = vor.u32 %v2985_v49, %v2525_v48  ;;  %1259 = vmatmul.bf16.vlgmr.msra.gmra.mxu2 %v3330_v51  ;;  %1272 = vmatmul.bf16.vlgmr.msra.gmra.mxu3 %v3343_v57  ;;  %v1951_v44 = vld [vmem:[%s4456_s1 + $0x50] sm:$0xf0]  ;;  %v2098_v46 = vor.u32 %v2875_v35, %v2095_v36 }
  0x27   :  { %1316 = vmatpush.bf16.msrb.mxu3 %v2034_v47  ;;  %v2654_v63 = vor.u32 %v3017_v52, %v2653_v50  ;;  %v2509_v1 = vld [vmem:[%s4456_s1 + $0x4a0] sm:$0xf]  ;;  %v2981_v2 = vld [vmem:[%s4456_s1 + $0x4ac] sm:$0xf0]  ;;  %1233 = vmatmul.bf16.vlgmr.msra.gmra.mxu0 %v3341_v55  ;;  %v2871_v48 = vld [vmem:[%s4456_s1 + $0x144] sm:$0xf]  ;;  %v1954_v52 = vor.u32 %v2839_v43, %v1951_v44 }
  0x28   :  { %v2637_v3 = vld [vmem:[%s4456_s1 + $0x5a0] sm:$0xf]  ;;  %v3013_v4 = vld [vmem:[%s4456_s1 + $0x5ac] sm:$0xf0]  ;;  %1310 = vmatpush.bf16.msrb.mxu2 %v2686_v56  ;;  %1278 = vmatpush.bf16.msrb.mxu0 %v2526_v60  ;;  %v2510_v9 = vor.u32 %v2981_v2, %v2509_v1  ;;  %v2079_v49 = vld [vmem:[%s4456_s1 + $0x150] sm:$0xf0] }
  0x29   :  { %1291 = vmatpush.bf16.msrb.mxu1 %v2654_v63  ;;  %v2638_v12 = vor.u32 %v3013_v4, %v2637_v3  ;;  %v2493_v14 = vld [vmem:[%s4456_s1 + $0x480] sm:$0xf]  ;;  %v2977_v15 = vld [vmem:[%s4456_s1 + $0x48c] sm:$0xf0]  ;;  %v1935_v60 = vld [vmem:[%s4456_s1 + $0x30] sm:$0xf0]  ;;  %v2082_v61 = vor.u32 %v2871_v48, %v2079_v49 }
  0x2a   :  { %v2621_v16 = vld [vmem:[%s4456_s1 + $0x580] sm:$0xf]  ;;  %v3009_v17 = vld [vmem:[%s4456_s1 + $0x58c] sm:$0xf0]  ;;  %v2494_v21 = vor.u32 %v2977_v15, %v2493_v14  ;;  %v2867_v63 = vld [vmem:[%s4456_s1 + $0x124] sm:$0xf] }
  0x2b   :  { %1317 = vmatpush.bf16.msrb.mxu3 %v2018_v0  ;;  %v2622_v24 = vor.u32 %v3009_v17, %v2621_v16  ;;  %v2477_v26 = vld [vmem:[%s4456_s1 + $0x460] sm:$0xf]  ;;  %v2973_v27 = vld [vmem:[%s4456_s1 + $0x46c] sm:$0xf0]  ;;  %v2063_v0 = vld [vmem:[%s4456_s1 + $0x130] sm:$0xf0] }
  0x2c   :  { %1329 = vmatpush.bf16.msra.mxu2 %v2162_v59  ;;  %1279 = vmatpush.bf16.msrb.mxu0 %v2510_v9  ;;  %v2605_v28 = vld [vmem:[%s4456_s1 + $0x560] sm:$0xf]  ;;  %v3005_v29 = vld [vmem:[%s4456_s1 + $0x56c] sm:$0xf0]  ;;  %v2478_v34 = vor.u32 %v2973_v27, %v2477_v26  ;;  %v2835_v59 = vld [vmem:[%s4456_s1 + $0x24] sm:$0xf]  ;;  %v2066_v14 = vor.u32 %v2867_v63, %v2063_v0 }
  0x2d   :  { %1292 = vmatpush.bf16.msrb.mxu1 %v2638_v12  ;;  %v27_v32 = vld [vmem:[%s4457_s0 + $0x30] sm:$0xff]  ;;  %v2606_v37 = vor.u32 %v3005_v29, %v2605_v28  ;;  %v2461_v39 = vld [vmem:[%s4456_s1 + $0x440] sm:$0xf]  ;;  %v1938_v3 = vor.u32 %v2835_v59, %v1935_v60  ;;  %v2923_v10 = vld [vmem:[%s4456_s1 + $0x2e4] sm:$0xf] }
  0x2e   :  { %v2969_v40 = vld [vmem:[%s4456_s1 + $0x44c] sm:$0xf0]  ;;  %v2589_v41 = vld [vmem:[%s4456_s1 + $0x540] sm:$0xf]  ;;  %v3453_v45 = vpack.c.bf16 %v27_v32, %v27_v32  ;;  %v1919_v9 = vld [vmem:[%s4456_s1 + $0x10] sm:$0xf0] }
  0x2f   :  { %1318 = vmatpush.bf16.msrb.mxu3 %v2002_v13  ;;  %v3001_v42 = vld [vmem:[%s4456_s1 + $0x54c] sm:$0xf0]  ;;  %v2462_v47 = vor.u32 %v2969_v40, %v2461_v39  ;;  %v2445_v53 = vld [vmem:[%s4456_s1 + $0x420] sm:$0xf]  ;;  %v2287_v11 = vld [vmem:[%s4456_s1 + $0x2f0] sm:$0xf0] }
  0x30   :  { %1330 = vmatpush.bf16.msra.mxu2 %v2146_v8  ;;  %1280 = vmatpush.bf16.msrb.mxu0 %v2494_v21  ;;  %v2590_v50 = vor.u32 %v3001_v42, %v2589_v41  ;;  %v2965_v54 = vld [vmem:[%s4456_s1 + $0x42c] sm:$0xf0]  ;;  %v2573_v56 = vld [vmem:[%s4456_s1 + $0x520] sm:$0xf]  ;;  %v2831_v8 = vld [vmem:[%s4456_s1 + $0x4] sm:$0xf] }
  0x31   :  { %1293 = vmatpush.bf16.msrb.mxu1 %v2622_v24  ;;  %v2997_v58 = vld [vmem:[%s4456_s1 + $0x52c] sm:$0xf0]  ;;  %v2446_v62 = vor.u32 %v2965_v54, %v2445_v53  ;;  %v2429_v1 = vld [vmem:[%s4456_s1 + $0x400] sm:$0xf]  ;;  %v2955_v12 = vld [vmem:[%s4456_s1 + $0x3e4] sm:$0xf]  ;;  %v2290_v24 = vor.u32 %v2923_v10, %v2287_v11 }
  0x32   :  { %v2574_v2 = vor.u32 %v2997_v58, %v2573_v56  ;;  %v2961_v4 = vld [vmem:[%s4456_s1 + $0x40c] sm:$0xf0]  ;;  %v2557_v5 = vld [vmem:[%s4456_s1 + $0x500] sm:$0xf]  ;;  %v2415_v13 = vld [vmem:[%s4456_s1 + $0x3f0] sm:$0xf0] }
  0x33   :  { %1319 = vmatpush.bf16.msrb.mxu3 %v1986_v25  ;;  %v2993_v6 = vld [vmem:[%s4456_s1 + $0x50c] sm:$0xf0]  ;;  %v2430_v15 = vor.u32 %v2961_v4, %v2429_v1  ;;  %v2987_v16 = vld [vmem:[%s4456_s1 + $0x4e4] sm:$0xf]  ;;  %v2543_v17 = vld [vmem:[%s4456_s1 + $0x4f0] sm:$0xf0]  ;;  %v2418_v25 = vor.u32 %v2955_v12, %v2415_v13 }
  0x34   :  { %1331 = vmatpush.bf16.msra.mxu2 %v2130_v20  ;;  %1281 = vmatpush.bf16.msrb.mxu0 %v2478_v34  ;;  %v25_v18 = vld [vmem:[%s4457_s0 + $0x20] sm:$0xff]  ;;  %v2558_v19 = vor.u32 %v2993_v6, %v2557_v5  ;;  %v1922_v20 = vor.u32 %v2831_v8, %v1919_v9  ;;  %v2047_v22 = vld [vmem:[%s4456_s1 + $0x110] sm:$0xf0]  ;;  %v26_v23 = vld [vmem:[%s4457_s0 + $0x28] sm:$0xff]  ;;  %v2546_v29 = vor.u32 %v2987_v16, %v2543_v17 }
  0x35   :  { %1294 = vmatpush.bf16.msrb.mxu1 %v2606_v37  ;;  %v2863_v21 = vld [vmem:[%s4456_s1 + $0x104] sm:$0xf]  ;;  %v2671_v27 = vld [vmem:[%s4456_s1 + $0x5f0] sm:$0xf0]  ;;  %v3544_v30 = vpack.c.bf16 %v25_v18, %v25_v18  ;;  %v3555_v35 = vpack.c.bf16 %v26_v23, %v26_v23 }
  0x36   :  { %2699 = vmatmul.msk.bf16.vlgmr.msrb.gmra.mxu2 %vm1221_vm0, %v3453_v45  ;;  %v3019_v26 = vld [vmem:[%s4456_s1 + $0x5e4] sm:$0xf]  ;;  %v2271_v31 = vld [vmem:[%s4456_s1 + $0x2d0] sm:$0xf0]  ;;  %v2050_v34 = vor.u32 %v2863_v21, %v2047_v22 }
  0x37   :  { %1320 = vmatpush.bf16.msrb.mxu3 %v1970_v38  ;;  %v2919_v28 = vld [vmem:[%s4456_s1 + $0x2c4] sm:$0xf]  ;;  %v2527_v37 = vld [vmem:[%s4456_s1 + $0x4d0] sm:$0xf0]  ;;  %v2674_v38 = vor.u32 %v3019_v26, %v2671_v27 }
  0x38   :  { %1332 = vmatpush.bf16.msra.mxu2 %v2114_v33  ;;  %1282 = vmatpush.bf16.msrb.mxu0 %v2462_v47  ;;  %v2951_v32 = vld [vmem:[%s4456_s1 + $0x3c4] sm:$0xf]  ;;  %v2399_v33 = vld [vmem:[%s4456_s1 + $0x3d0] sm:$0xf0]  ;;  %v2274_v39 = vor.u32 %v2919_v28, %v2271_v31 }
  0x39   :  { %1295 = vmatpush.bf16.msrb.mxu1 %v2590_v50  ;;  %v2983_v36 = vld [vmem:[%s4456_s1 + $0x4c4] sm:$0xf]  ;;  %v2402_v40 = vor.u32 %v2951_v32, %v2399_v33  ;;  %v2655_v42 = vld [vmem:[%s4456_s1 + $0x5d0] sm:$0xf0] }
  0x3a   :  { %v3015_v41 = vld [vmem:[%s4456_s1 + $0x5c4] sm:$0xf]  ;;  %v2530_v44 = vor.u32 %v2983_v36, %v2527_v37  ;;  %v2383_v48 = vld [vmem:[%s4456_s1 + $0x3b0] sm:$0xf0] }
  0x3b   :  { %1321 = vmatpush.bf16.msrb.mxu3 %v1954_v52  ;;  %v2915_v43 = vld [vmem:[%s4456_s1 + $0x2a4] sm:$0xf]  ;;  %v2511_v50 = vld [vmem:[%s4456_s1 + $0x4b0] sm:$0xf0]  ;;  %v2658_v52 = vor.u32 %v3015_v41, %v2655_v42 }
  0x3c   :  { %1333 = vmatpush.bf16.msra.mxu2 %v2098_v46  ;;  %1283 = vmatpush.bf16.msrb.mxu0 %v2446_v62  ;;  %v2255_v46 = vld [vmem:[%s4456_s1 + $0x2b0] sm:$0xf0]  ;;  %v2947_v47 = vld [vmem:[%s4456_s1 + $0x3a4] sm:$0xf] }
  0x3d   :  { %1296 = vmatpush.bf16.msrb.mxu1 %v2574_v2  ;;  %v2979_v49 = vld [vmem:[%s4456_s1 + $0x4a4] sm:$0xf]  ;;  %v2258_v53 = vor.u32 %v2915_v43, %v2255_v46  ;;  %v2386_v54 = vor.u32 %v2947_v47, %v2383_v48  ;;  %v2639_v58 = vld [vmem:[%s4456_s1 + $0x5b0] sm:$0xf0] }
  0x3e   :  { %v3011_v56 = vld [vmem:[%s4456_s1 + $0x5a4] sm:$0xf]  ;;  %v2514_v60 = vor.u32 %v2979_v49, %v2511_v50  ;;  %v2367_v63 = vld [vmem:[%s4456_s1 + $0x390] sm:$0xf0] }
  0x3f   :  { %1322 = vmatpush.bf16.msrb.mxu3 %v1938_v3  ;;  %v2911_v59 = vld [vmem:[%s4456_s1 + $0x284] sm:$0xf]  ;;  %v2495_v1 = vld [vmem:[%s4456_s1 + $0x490] sm:$0xf0]  ;;  %v2642_v2 = vor.u32 %v3011_v56, %v2639_v58  ;;  %v2037_v56 = vld [vmem:[%s4456_s1 + $0xe8] sm:$0xf] }
  0x40   :  { %1334 = vmatpush.bf16.msra.mxu2 %v2082_v61  ;;  %1284 = vmatpush.bf16.msrb.mxu0 %v2430_v15  ;;  %v2239_v61 = vld [vmem:[%s4456_s1 + $0x290] sm:$0xf0]  ;;  %v2943_v62 = vld [vmem:[%s4456_s1 + $0x384] sm:$0xf]  ;;  %v2862_v58 = vld [vmem:[%s4456_s1 + $0xf4] sm:$0xf0] }
  0x41   :  { %1297 = vmatpush.bf16.msrb.mxu1 %v2558_v19  ;;  %v2975_v0 = vld [vmem:[%s4456_s1 + $0x484] sm:$0xf]  ;;  %v2242_v3 = vor.u32 %v2911_v59, %v2239_v61  ;;  %v2370_v4 = vor.u32 %v2943_v62, %v2367_v63  ;;  %v2623_v6 = vld [vmem:[%s4456_s1 + $0x590] sm:$0xf0]  ;;  %v2293_v62 = vld [vmem:[%s4456_s1 + $0x2e8] sm:$0xf] }
  0x42   :  { %v3007_v5 = vld [vmem:[%s4456_s1 + $0x584] sm:$0xf]  ;;  %v2498_v9 = vor.u32 %v2975_v0, %v2495_v1  ;;  %v2223_v10 = vld [vmem:[%s4456_s1 + $0x270] sm:$0xf0]  ;;  %v2926_v63 = vld [vmem:[%s4456_s1 + $0x2f4] sm:$0xf0] }
  0x43   :  { %1323 = vmatpush.bf16.msrb.mxu3 %v1922_v20  ;;  %1285 = vmatmul.bf16.vlgmr.msrb.gmra.mxu0 %v3544_v30  ;;  %v2907_v8 = vld [vmem:[%s4456_s1 + $0x264] sm:$0xf]  ;;  %v2351_v12 = vld [vmem:[%s4456_s1 + $0x370] sm:$0xf0]  ;;  %v2626_v15 = vor.u32 %v3007_v5, %v2623_v6  ;;  %v2038_v5 = vor.u32 %v2862_v58, %v2037_v56  ;;  %v2421_v6 = vld [vmem:[%s4456_s1 + $0x3e8] sm:$0xf] }
  0x44   :  { %1335 = vmatpush.bf16.msra.mxu2 %v2066_v14  ;;  %1342 = vmatpush.bf16.msra.mxu0 %v2290_v24  ;;  %v2939_v11 = vld [vmem:[%s4456_s1 + $0x364] sm:$0xf]  ;;  %v2479_v14 = vld [vmem:[%s4456_s1 + $0x470] sm:$0xf0]  ;;  %v2226_v16 = vor.u32 %v2907_v8, %v2223_v10  ;;  %v2958_v8 = vld [vmem:[%s4456_s1 + $0x3f4] sm:$0xf0] }
  0x45   :  { %1355 = vmatpush.bf16.msra.mxu1 %v2418_v25  ;;  %v2971_v13 = vld [vmem:[%s4456_s1 + $0x464] sm:$0xf]  ;;  %v2354_v17 = vor.u32 %v2939_v11, %v2351_v12  ;;  %v2607_v19 = vld [vmem:[%s4456_s1 + $0x570] sm:$0xf0]  ;;  %v2165_v10 = vld [vmem:[%s4456_s1 + $0x1e8] sm:$0xf]  ;;  %v2294_v12 = vor.u32 %v2926_v63, %v2293_v62 }
  0x46   :  { %1298 = vmatmul.bf16.vlgmr.msrb.gmra.mxu1 %v3555_v35  ;;  %1324 = vmatmul.bf16.vlgmr.msrb.gmra.mxu3 %v3341_v55  ;;  %v3003_v18 = vld [vmem:[%s4456_s1 + $0x564] sm:$0xf]  ;;  %v2482_v21 = vor.u32 %v2971_v13, %v2479_v14  ;;  %v2207_v22 = vld [vmem:[%s4456_s1 + $0x250] sm:$0xf0]  ;;  %v2894_v11 = vld [vmem:[%s4456_s1 + $0x1f4] sm:$0xf0] }
  0x47   :  { %1368 = vmatpush.bf16.msra.mxu3 %v2546_v29  ;;  %v2903_v20 = vld [vmem:[%s4456_s1 + $0x244] sm:$0xf]  ;;  %v2335_v24 = vld [vmem:[%s4456_s1 + $0x350] sm:$0xf0]  ;;  %v2610_v27 = vor.u32 %v3003_v18, %v2607_v19  ;;  %v2021_v14 = vld [vmem:[%s4456_s1 + $0xc8] sm:$0xf]  ;;  %v2166_v19 = vor.u32 %v2894_v11, %v2165_v10 }
  0x48   :  { %1336 = vmatpush.bf16.msra.mxu2 %v2050_v34  ;;  %1343 = vmatpush.bf16.msra.mxu0 %v2274_v39  ;;  %v2935_v23 = vld [vmem:[%s4456_s1 + $0x344] sm:$0xf]  ;;  %v2463_v26 = vld [vmem:[%s4456_s1 + $0x450] sm:$0xf0]  ;;  %v2210_v28 = vor.u32 %v2903_v20, %v2207_v22  ;;  %v2922_v18 = vld [vmem:[%s4456_s1 + $0x2d4] sm:$0xf0] }
  0x49   :  { %1356 = vmatpush.bf16.msra.mxu1 %v2402_v40  ;;  %v2967_v25 = vld [vmem:[%s4456_s1 + $0x444] sm:$0xf]  ;;  %v2338_v29 = vor.u32 %v2935_v23, %v2335_v24  ;;  %v2591_v32 = vld [vmem:[%s4456_s1 + $0x550] sm:$0xf0]  ;;  %v2405_v20 = vld [vmem:[%s4456_s1 + $0x3c8] sm:$0xf] }
  0x4a   :  { %v2999_v31 = vld [vmem:[%s4456_s1 + $0x544] sm:$0xf]  ;;  %v2466_v34 = vor.u32 %v2967_v25, %v2463_v26  ;;  %v2191_v36 = vld [vmem:[%s4456_s1 + $0x230] sm:$0xf0]  ;;  %v2149_v23 = vld [vmem:[%s4456_s1 + $0x1c8] sm:$0xf] }
  0x4b   :  { %1369 = vmatpush.bf16.msra.mxu3 %v2530_v44  ;;  %1337 = vmatmul.bf16.vlgmr.msra.gmra.mxu2 %v3374_v7  ;;  %v2899_v33 = vld [vmem:[%s4456_s1 + $0x224] sm:$0xf]  ;;  %v2447_v40 = vld [vmem:[%s4456_s1 + $0x430] sm:$0xf0]  ;;  %v2594_v41 = vor.u32 %v2999_v31, %v2591_v32  ;;  %v2890_v24 = vld [vmem:[%s4456_s1 + $0x1d4] sm:$0xf0] }
  0x4c   :  { %1381 = vmatpush.bf16.msrb.mxu2 %v2674_v38  ;;  %1344 = vmatpush.bf16.msra.mxu0 %v2258_v53  ;;  %v2931_v37 = vld [vmem:[%s4456_s1 + $0x324] sm:$0xf]  ;;  %v2319_v38 = vld [vmem:[%s4456_s1 + $0x330] sm:$0xf0]  ;;  %v2194_v44 = vor.u32 %v2899_v33, %v2191_v36  ;;  %v2005_v26 = vld [vmem:[%s4456_s1 + $0xa8] sm:$0xf]  ;;  %v2150_v32 = vor.u32 %v2890_v24, %v2149_v23 }
  0x4d   :  { %1357 = vmatpush.bf16.msra.mxu1 %v2386_v54  ;;  %v2963_v39 = vld [vmem:[%s4456_s1 + $0x424] sm:$0xf]  ;;  %v2575_v43 = vld [vmem:[%s4456_s1 + $0x530] sm:$0xf0]  ;;  %v2322_v46 = vor.u32 %v2931_v37, %v2319_v38  ;;  %v2918_v31 = vld [vmem:[%s4456_s1 + $0x2b4] sm:$0xf0] }
  0x4e   :  { %v2995_v42 = vld [vmem:[%s4456_s1 + $0x524] sm:$0xf]  ;;  %v2175_v48 = vld [vmem:[%s4456_s1 + $0x210] sm:$0xf0]  ;;  %v2450_v50 = vor.u32 %v2963_v39, %v2447_v40  ;;  %v2389_v33 = vld [vmem:[%s4456_s1 + $0x3a8] sm:$0xf] }
  0x4f   :  { %1370 = vmatpush.bf16.msra.mxu3 %v2514_v60  ;;  %v2895_v47 = vld [vmem:[%s4456_s1 + $0x204] sm:$0xf]  ;;  %v2431_v54 = vld [vmem:[%s4456_s1 + $0x410] sm:$0xf0]  ;;  %v2578_v60 = vor.u32 %v2995_v42, %v2575_v43  ;;  %v2133_v37 = vld [vmem:[%s4456_s1 + $0x1a8] sm:$0xf] }
  0x50   :  { %1382 = vmatpush.bf16.msrb.mxu2 %v2658_v52  ;;  %1345 = vmatpush.bf16.msra.mxu0 %v2242_v3  ;;  %v2927_v49 = vld [vmem:[%s4456_s1 + $0x304] sm:$0xf]  ;;  %v2303_v52 = vld [vmem:[%s4456_s1 + $0x310] sm:$0xf0]  ;;  %v2178_v0 = vor.u32 %v2895_v47, %v2175_v48  ;;  %v2886_v38 = vld [vmem:[%s4456_s1 + $0x1b4] sm:$0xf0] }
  0x51   :  { %1358 = vmatpush.bf16.msra.mxu1 %v2370_v4  ;;  %v2959_v53 = vld [vmem:[%s4456_s1 + $0x404] sm:$0xf]  ;;  %v2687_v61 = vld [vmem:[%s4456_s1 + $0x610] sm:$0xf0]  ;;  %v2306_v1 = vor.u32 %v2927_v49, %v2303_v52  ;;  %v1989_v40 = vld [vmem:[%s4456_s1 + $0x88] sm:$0xf] }
  0x52   :  { %v3023_v59 = vld [vmem:[%s4456_s1 + $0x604] sm:$0xf]  ;;  %v2559_v3 = vld [vmem:[%s4456_s1 + $0x510] sm:$0xf0]  ;;  %v2434_v4 = vor.u32 %v2959_v53, %v2431_v54  ;;  %v2245_v43 = vld [vmem:[%s4456_s1 + $0x288] sm:$0xf] }
  0x53   :  { %1371 = vmatpush.bf16.msra.mxu3 %v2498_v9  ;;  %v2690_v9 = vor.u32 %v3023_v59, %v2687_v61  ;;  %v2373_v47 = vld [vmem:[%s4456_s1 + $0x388] sm:$0xf]  ;;  %v2946_v48 = vld [vmem:[%s4456_s1 + $0x394] sm:$0xf0] }
  0x54   :  { %1383 = vmatpush.bf16.msrb.mxu2 %v2642_v2  ;;  %1346 = vmatpush.bf16.msra.mxu0 %v2226_v16  ;;  %v2991_v2 = vld [vmem:[%s4456_s1 + $0x504] sm:$0xf]  ;;  %v2422_v16 = vor.u32 %v2958_v8, %v2421_v6  ;;  %v2882_v52 = vld [vmem:[%s4456_s1 + $0x194] sm:$0xf0]  ;;  %v1973_v54 = vld [vmem:[%s4456_s1 + $0x68] sm:$0xf]  ;;  %v2374_v58 = vor.u32 %v2946_v48, %v2373_v47 }
  0x55   :  { %1359 = vmatpush.bf16.msra.mxu1 %v2354_v17  ;;  %v2562_v13 = vor.u32 %v2991_v2, %v2559_v3  ;;  %v2277_v17 = vld [vmem:[%s4456_s1 + $0x2c8] sm:$0xf]  ;;  %v2846_v56 = vld [vmem:[%s4456_s1 + $0x74] sm:$0xf0]  ;;  %v2860_v47 = vld [vmem:[%s4456_s1 + $0xec] sm:$0xf] }
  0x56   :  { %v2278_v25 = vor.u32 %v2922_v18, %v2277_v17  ;;  %v2229_v59 = vld [vmem:[%s4456_s1 + $0x268] sm:$0xf]  ;;  %v2942_v63 = vld [vmem:[%s4456_s1 + $0x374] sm:$0xf0]  ;;  %v2039_v48 = vld [vmem:[%s4456_s1 + $0xf8] sm:$0xf0] }
  0x57   :  { %1372 = vmatpush.bf16.msra.mxu3 %v2482_v21  ;;  %v2954_v21 = vld [vmem:[%s4456_s1 + $0x3d4] sm:$0xf0]  ;;  %v2357_v62 = vld [vmem:[%s4456_s1 + $0x368] sm:$0xf] }
  0x58   :  { %1384 = vmatpush.bf16.msrb.mxu2 %v2626_v15  ;;  %1347 = vmatpush.bf16.msra.mxu0 %v2210_v28  ;;  %v2858_v15 = vld [vmem:[%s4456_s1 + $0xd4] sm:$0xf0]  ;;  %v2406_v28 = vor.u32 %v2954_v21, %v2405_v20  ;;  %v2358_v6 = vor.u32 %v2942_v63, %v2357_v62  ;;  %v2213_v8 = vld [vmem:[%s4456_s1 + $0x248] sm:$0xf]  ;;  %v2042_v63 = vor.u32 %v2860_v47, %v2039_v48 }
  0x59   :  { %1360 = vmatpush.bf16.msra.mxu1 %v2338_v29  ;;  %v2022_v22 = vor.u32 %v2858_v15, %v2021_v14  ;;  %v2261_v29 = vld [vmem:[%s4456_s1 + $0x2a8] sm:$0xf]  ;;  %v2878_v2 = vld [vmem:[%s4456_s1 + $0x174] sm:$0xf0] }
  0x5a   :  { %v2262_v39 = vor.u32 %v2918_v31, %v2261_v29  ;;  %v2341_v11 = vld [vmem:[%s4456_s1 + $0x348] sm:$0xf]  ;;  %v2874_v15 = vld [vmem:[%s4456_s1 + $0x154] sm:$0xf0] }
  0x5b   :  { %1373 = vmatpush.bf16.msra.mxu3 %v2466_v34  ;;  %v2950_v34 = vld [vmem:[%s4456_s1 + $0x3b4] sm:$0xf0]  ;;  %v2085_v14 = vld [vmem:[%s4456_s1 + $0x148] sm:$0xf] }
  0x5c   :  { %1385 = vmatpush.bf16.msrb.mxu2 %v2610_v27  ;;  %1348 = vmatpush.bf16.msra.mxu0 %v2194_v44  ;;  %v2854_v27 = vld [vmem:[%s4456_s1 + $0xb4] sm:$0xf0]  ;;  %v2390_v42 = vor.u32 %v2950_v34, %v2389_v33  ;;  %v1941_v17 = vld [vmem:[%s4456_s1 + $0x28] sm:$0xf] }
  0x5d   :  { %1361 = vmatpush.bf16.msra.mxu1 %v2322_v46  ;;  %v2006_v36 = vor.u32 %v2854_v27, %v2005_v26  ;;  %v2914_v44 = vld [vmem:[%s4456_s1 + $0x294] sm:$0xf0]  ;;  %v2134_v46 = vor.u32 %v2886_v38, %v2133_v37  ;;  %v2197_v20 = vld [vmem:[%s4456_s1 + $0x228] sm:$0xf] }
  0x5e   :  { %v2246_v53 = vor.u32 %v2914_v44, %v2245_v43  ;;  %v2838_v18 = vld [vmem:[%s4456_s1 + $0x34] sm:$0xf0]  ;;  %v2325_v23 = vld [vmem:[%s4456_s1 + $0x328] sm:$0xf] }
  0x5f   :  { %1374 = vmatpush.bf16.msra.mxu3 %v2450_v50  ;;  %v2117_v50 = vld [vmem:[%s4456_s1 + $0x188] sm:$0xf]  ;;  %v2902_v21 = vld [vmem:[%s4456_s1 + $0x234] sm:$0xf0] }
  0x60   :  { %1386 = vmatpush.bf16.msrb.mxu2 %v2594_v41  ;;  %1349 = vmatpush.bf16.msra.mxu0 %v2178_v0  ;;  %v2850_v41 = vld [vmem:[%s4456_s1 + $0x94] sm:$0xf0]  ;;  %v2118_v61 = vor.u32 %v2882_v52, %v2117_v50  ;;  %v1974_v0 = vor.u32 %v2846_v56, %v1973_v54  ;;  %v2069_v26 = vld [vmem:[%s4456_s1 + $0x128] sm:$0xf]  ;;  %v2198_v29 = vor.u32 %v2902_v21, %v2197_v20 }
  0x61   :  { %1362 = vmatpush.bf16.msra.mxu1 %v2306_v1  ;;  %v1990_v49 = vor.u32 %v2850_v41, %v1989_v40  ;;  %v2101_v1 = vld [vmem:[%s4456_s1 + $0x168] sm:$0xf]  ;;  %v2934_v24 = vld [vmem:[%s4456_s1 + $0x334] sm:$0xf0] }
  0x62   :  { %v2102_v10 = vor.u32 %v2878_v2, %v2101_v1  ;;  %v2870_v27 = vld [vmem:[%s4456_s1 + $0x134] sm:$0xf0]  ;;  %v2326_v34 = vor.u32 %v2934_v24, %v2325_v23  ;;  %v2181_v37 = vld [vmem:[%s4456_s1 + $0x208] sm:$0xf]  ;;  %v2856_v1 = vld [vmem:[%s4456_s1 + $0xcc] sm:$0xf] }
  0x63   :  { %1375 = vmatpush.bf16.msra.mxu3 %v2434_v4  ;;  %1350 = vmatmul.bf16.vlgmr.msra.gmra.mxu0 %v3330_v51  ;;  %v1957_v4 = vld [vmem:[%s4456_s1 + $0x48] sm:$0xf]  ;;  %v2834_v31 = vld [vmem:[%s4456_s1 + $0x14] sm:$0xf0]  ;;  %v2070_v40 = vor.u32 %v2870_v27, %v2069_v26  ;;  %v2023_v2 = vld [vmem:[%s4456_s1 + $0xd8] sm:$0xf0] }
  0x64   :  { %1387 = vmatpush.bf16.msrb.mxu2 %v2578_v60  ;;  %1433 = vmatpush.bf16.msrb.mxu0 %v2294_v12  ;;  %v2910_v60 = vld [vmem:[%s4456_s1 + $0x274] sm:$0xf0]  ;;  %v2677_v52 = vld [vmem:[%s4456_s1 + $0x5e8] sm:$0xf]  ;;  %v2135_v23 = vld [vmem:[%s4456_s1 + $0x1b8] sm:$0xf0] }
  0x65   :  { %1407 = vmatpush.bf16.msrb.mxu1 %v2038_v5  ;;  %v2230_v3 = vor.u32 %v2910_v60, %v2229_v59  ;;  %v2842_v5 = vld [vmem:[%s4456_s1 + $0x54] sm:$0xf0]  ;;  %v2533_v54 = vld [vmem:[%s4456_s1 + $0x4c8] sm:$0xf]  ;;  %v2892_v60 = vld [vmem:[%s4456_s1 + $0x1ec] sm:$0xf] }
  0x66   :  { %1376 = vmatmul.bf16.vlgmr.msra.gmra.mxu3 %v3544_v30  ;;  %1363 = vmatmul.bf16.vlgmr.msra.gmra.mxu1 %v3343_v57  ;;  %v2938_v12 = vld [vmem:[%s4456_s1 + $0x354] sm:$0xf0]  ;;  %v2501_v20 = vld [vmem:[%s4456_s1 + $0x488] sm:$0xf]  ;;  %v2848_v26 = vld [vmem:[%s4456_s1 + $0x8c] sm:$0xf] }
  0x67   :  { %1401 = vmatpush.bf16.msrb.mxu3 %v2690_v9  ;;  %v2906_v9 = vld [vmem:[%s4456_s1 + $0x254] sm:$0xf0]  ;;  %v1991_v27 = vld [vmem:[%s4456_s1 + $0x98] sm:$0xf0]  ;;  %v2469_v47 = vld [vmem:[%s4456_s1 + $0x448] sm:$0xf] }
  0x68   :  { %1388 = vmatpush.bf16.msrb.mxu2 %v2562_v13  ;;  %1434 = vmatpush.bf16.msrb.mxu0 %v2278_v25  ;;  %v1958_v13 = vor.u32 %v2842_v5, %v1957_v4  ;;  %v1942_v25 = vor.u32 %v2838_v18, %v1941_v17  ;;  %v2990_v33 = vld [vmem:[%s4456_s1 + $0x4f4] sm:$0xf0]  ;;  %v2661_v5 = vld [vmem:[%s4456_s1 + $0x5c8] sm:$0xf] }
  0x69   :  { %1408 = vmatpush.bf16.msrb.mxu1 %v2022_v22  ;;  %v2086_v22 = vor.u32 %v2874_v15, %v2085_v14  ;;  %v2898_v38 = vld [vmem:[%s4456_s1 + $0x214] sm:$0xf0]  ;;  %v2852_v14 = vld [vmem:[%s4456_s1 + $0xac] sm:$0xf]  ;;  %v2007_v15 = vld [vmem:[%s4456_s1 + $0xb8] sm:$0xf0] }
  0x6a   :  { %v2930_v41 = vld [vmem:[%s4456_s1 + $0x314] sm:$0xf0]  ;;  %v2182_v50 = vor.u32 %v2898_v38, %v2181_v37  ;;  %v2645_v18 = vld [vmem:[%s4456_s1 + $0x5a8] sm:$0xf]  ;;  %v2010_v24 = vor.u32 %v2852_v14, %v2007_v15  ;;  %v2119_v37 = vld [vmem:[%s4456_s1 + $0x198] sm:$0xf0]  ;;  %v1994_v38 = vor.u32 %v2848_v26, %v1991_v27 }
  0x6b   :  { %1420 = vmatpush.bf16.msra.mxu3 %v2166_v19  ;;  %1389 = vmatmul.bf16.vlgmr.msrb.gmra.mxu2 %v3555_v35  ;;  %v2342_v19 = vor.u32 %v2938_v12, %v2341_v11  ;;  %v3026_v43 = vld [vmem:[%s4456_s1 + $0x614] sm:$0xf0]  ;;  %v2151_v11 = vld [vmem:[%s4456_s1 + $0x1d8] sm:$0xf0]  ;;  %v2026_v12 = vor.u32 %v2856_v1, %v2023_v2 }
  0x6c   :  { %1446 = vmatpush.bf16.msra.mxu2 %v2422_v16  ;;  %1435 = vmatpush.bf16.msrb.mxu0 %v2262_v39  ;;  %v2214_v16 = vor.u32 %v2906_v9, %v2213_v8  ;;  %v2309_v39 = vld [vmem:[%s4456_s1 + $0x308] sm:$0xf]  ;;  %v2982_v9 = vld [vmem:[%s4456_s1 + $0x4b4] sm:$0xf0]  ;;  %v2087_v1 = vld [vmem:[%s4456_s1 + $0x158] sm:$0xf0] }
  0x6d   :  { %1409 = vmatpush.bf16.msrb.mxu1 %v2006_v36  ;;  %v2053_v36 = vld [vmem:[%s4456_s1 + $0x108] sm:$0xf]  ;;  %v2310_v56 = vor.u32 %v2930_v41, %v2309_v39  ;;  %v2978_v21 = vld [vmem:[%s4456_s1 + $0x494] sm:$0xf0]  ;;  %v1975_v41 = vld [vmem:[%s4456_s1 + $0x78] sm:$0xf0] }
  0x6e   :  { %v2517_v8 = vld [vmem:[%s4456_s1 + $0x4a8] sm:$0xf]  ;;  %v2970_v48 = vld [vmem:[%s4456_s1 + $0x454] sm:$0xf0]  ;;  %v2071_v14 = vld [vmem:[%s4456_s1 + $0x138] sm:$0xf0] }
  0x6f   :  { %1421 = vmatpush.bf16.msra.mxu3 %v2150_v32  ;;  %v2549_v32 = vld [vmem:[%s4456_s1 + $0x4e8] sm:$0xf]  ;;  %v2423_v26 = vld [vmem:[%s4456_s1 + $0x3f8] sm:$0xf0] }
  0x70   :  { %1447 = vmatpush.bf16.msra.mxu2 %v2406_v28  ;;  %1436 = vmatpush.bf16.msrb.mxu0 %v2246_v53  ;;  %v1925_v28 = vld [vmem:[%s4456_s1 + $0x8] sm:$0xf]  ;;  %v3022_v53 = vld [vmem:[%s4456_s1 + $0x5f4] sm:$0xf0] }
  0x71   :  { %1410 = vmatpush.bf16.msrb.mxu1 %v1990_v49  ;;  %v1926_v44 = vor.u32 %v2834_v31, %v1925_v28  ;;  %v2550_v49 = vor.u32 %v2990_v33, %v2549_v32  ;;  %v2502_v28 = vor.u32 %v2978_v21, %v2501_v20  ;;  %v2629_v31 = vld [vmem:[%s4456_s1 + $0x588] sm:$0xf]  ;;  %v3010_v32 = vld [vmem:[%s4456_s1 + $0x594] sm:$0xf0]  ;;  %v2832_v20 = vld [vmem:[%s4456_s1 + $0xc] sm:$0xf] }
  0x72   :  { %v2485_v33 = vld [vmem:[%s4456_s1 + $0x468] sm:$0xf]  ;;  %v2630_v39 = vor.u32 %v3010_v32, %v2629_v31  ;;  %v1927_v21 = vld [vmem:[%s4456_s1 + $0x18] sm:$0xf0]  ;;  %v2920_v31 = vld [vmem:[%s4456_s1 + $0x2cc] sm:$0xf] }
  0x73   :  { %1422 = vmatpush.bf16.msra.mxu3 %v2134_v46  ;;  %v2866_v46 = vld [vmem:[%s4456_s1 + $0x114] sm:$0xf0]  ;;  %v1930_v32 = vor.u32 %v2832_v20, %v1927_v21  ;;  %v2359_v21 = vld [vmem:[%s4456_s1 + $0x378] sm:$0xf0] }
  0x74   :  { %1448 = vmatpush.bf16.msra.mxu2 %v2390_v42  ;;  %1437 = vmatpush.bf16.msrb.mxu0 %v2230_v3  ;;  %v2693_v42 = vld [vmem:[%s4456_s1 + $0x608] sm:$0xf]  ;;  %v2054_v62 = vor.u32 %v2866_v46, %v2053_v36  ;;  %v2880_v36 = vld [vmem:[%s4456_s1 + $0x18c] sm:$0xf]  ;;  %v3006_v46 = vld [vmem:[%s4456_s1 + $0x574] sm:$0xf0] }
  0x75   :  { %1411 = vmatpush.bf16.msrb.mxu1 %v1974_v0  ;;  %v2694_v59 = vor.u32 %v3026_v43, %v2693_v42  ;;  %v2678_v0 = vor.u32 %v3022_v53, %v2677_v52  ;;  %v2122_v43 = vor.u32 %v2880_v36, %v2119_v37  ;;  %v2055_v36 = vld [vmem:[%s4456_s1 + $0x118] sm:$0xf0] }
  0x76   :  { %2700 = vmatmul.msk.bf16.vlgmr.msrb.gmra.mxu3 %vm1221_vm0, %v3453_v45 }
  0x77   :  { %1423 = vmatpush.bf16.msra.mxu3 %v2118_v61  ;;  %v2167_v61 = vld [vmem:[%s4456_s1 + $0x1f8] sm:$0xf0] }
  0x78   :  { %1449 = vmatpush.bf16.msra.mxu2 %v2374_v58  ;;  %1438 = vmatpush.bf16.msrb.mxu0 %v2214_v16  ;;  %v2986_v58 = vld [vmem:[%s4456_s1 + $0x4d4] sm:$0xf0]  ;;  %v2170_v4 = vor.u32 %v2892_v60, %v2167_v61  ;;  %v2518_v16 = vor.u32 %v2982_v9, %v2517_v8  ;;  %v2597_v60 = vld [vmem:[%s4456_s1 + $0x548] sm:$0xf] }
  0x79   :  { %1412 = vmatpush.bf16.msrb.mxu1 %v1958_v13  ;;  %v2534_v3 = vor.u32 %v2986_v58, %v2533_v54  ;;  %v2840_v54 = vld [vmem:[%s4456_s1 + $0x4c] sm:$0xf]  ;;  %v2470_v58 = vor.u32 %v2970_v48, %v2469_v47  ;;  %v3002_v61 = vld [vmem:[%s4456_s1 + $0x554] sm:$0xf0]  ;;  %v2581_v9 = vld [vmem:[%s4456_s1 + $0x528] sm:$0xf] }
  0x7a   :  { %v2984_v47 = vld [vmem:[%s4456_s1 + $0x4cc] sm:$0xf]  ;;  %v2535_v48 = vld [vmem:[%s4456_s1 + $0x4d8] sm:$0xf0] }
  0x7b   :  { %1424 = vmatpush.bf16.msra.mxu3 %v2102_v10  ;;  %v2888_v10 = vld [vmem:[%s4456_s1 + $0x1cc] sm:$0xf] }
  0x7c   :  { %1450 = vmatpush.bf16.msra.mxu2 %v2358_v6  ;;  %1439 = vmatpush.bf16.msrb.mxu0 %v2198_v29  ;;  %v3018_v6 = vld [vmem:[%s4456_s1 + $0x5d4] sm:$0xf0]  ;;  %v2154_v17 = vor.u32 %v2888_v10, %v2151_v11  ;;  %v2437_v11 = vld [vmem:[%s4456_s1 + $0x408] sm:$0xf] }
  0x7d   :  { %1413 = vmatpush.bf16.msrb.mxu1 %v1942_v25  ;;  %v2662_v13 = vor.u32 %v3018_v6, %v2661_v5  ;;  %v1943_v5 = vld [vmem:[%s4456_s1 + $0x38] sm:$0xf0]  ;;  %v2998_v10 = vld [vmem:[%s4456_s1 + $0x534] sm:$0xf0] }
  0x7f   :  { %1425 = vmatpush.bf16.msra.mxu3 %v2086_v22  ;;  %v2884_v22 = vld [vmem:[%s4456_s1 + $0x1ac] sm:$0xf] }
  0x80   :  { %1451 = vmatpush.bf16.msra.mxu2 %v2342_v19  ;;  %1440 = vmatpush.bf16.msrb.mxu0 %v2182_v50  ;;  %v3014_v19 = vld [vmem:[%s4456_s1 + $0x5b4] sm:$0xf0]  ;;  %v2138_v29 = vor.u32 %v2884_v22, %v2135_v23  ;;  %v2103_v50 = vld [vmem:[%s4456_s1 + $0x178] sm:$0xf0] }
  0x81   :  { %1414 = vmatpush.bf16.msrb.mxu1 %v1926_v44  ;;  %v2646_v25 = vor.u32 %v3014_v19, %v2645_v18  ;;  %v2613_v44 = vld [vmem:[%s4456_s1 + $0x568] sm:$0xf]  ;;  %v2582_v18 = vor.u32 %v2998_v10, %v2581_v9  ;;  %v2976_v10 = vld [vmem:[%s4456_s1 + $0x48c] sm:$0xf] }
  0x82   :  { %v2614_v53 = vor.u32 %v3006_v46, %v2613_v44  ;;  %v2565_v19 = vld [vmem:[%s4456_s1 + $0x508] sm:$0xf]  ;;  %v2407_v46 = vld [vmem:[%s4456_s1 + $0x3d8] sm:$0xf0] }
  0x83   :  { %1426 = vmatpush.bf16.msra.mxu3 %v2070_v40  ;;  %1441 = vmatmul.bf16.vlgmr.msrb.gmra.mxu0 %v3330_v51  ;;  %v2844_v40 = vld [vmem:[%s4456_s1 + $0x6c] sm:$0xf] }
  0x84   :  { %1452 = vmatpush.bf16.msra.mxu2 %v2326_v34  ;;  %1492 = vmatpush.bf16.msra.mxu0 %v2694_v59  ;;  %v2974_v34 = vld [vmem:[%s4456_s1 + $0x474] sm:$0xf0]  ;;  %v1978_v52 = vor.u32 %v2844_v40, %v1975_v41 }
  0x85   :  { %1459 = vmatpush.bf16.msra.mxu1 %v2550_v49  ;;  %v2486_v42 = vor.u32 %v2974_v34, %v2485_v33  ;;  %v2876_v49 = vld [vmem:[%s4456_s1 + $0x16c] sm:$0xf]  ;;  %v2279_v33 = vld [vmem:[%s4456_s1 + $0x2d8] sm:$0xf0] }
  0x86   :  { %1415 = vmatmul.bf16.vlgmr.msrb.gmra.mxu1 %v3341_v55  ;;  %v2106_v59 = vor.u32 %v2876_v49, %v2103_v50  ;;  %v2864_v34 = vld [vmem:[%s4456_s1 + $0x10c] sm:$0xf] }
  0x87   :  { %1427 = vmatpush.bf16.msra.mxu3 %v2054_v62  ;;  %v2453_v62 = vld [vmem:[%s4456_s1 + $0x428] sm:$0xf]  ;;  %v2058_v44 = vor.u32 %v2864_v34, %v2055_v36  ;;  %v2916_v50 = vld [vmem:[%s4456_s1 + $0x2ac] sm:$0xf] }
  0x88   :  { %1453 = vmatpush.bf16.msra.mxu2 %v2310_v56  ;;  %1511 = vmatpush.bf16.msrb.mxu0 %v2170_v4  ;;  %v1959_v56 = vld [vmem:[%s4456_s1 + $0x58] sm:$0xf0]  ;;  %v2836_v4 = vld [vmem:[%s4456_s1 + $0x2c] sm:$0xf] }
  0x89   :  { %1460 = vmatpush.bf16.msra.mxu1 %v2534_v3  ;;  %v1962_v2 = vor.u32 %v2840_v54, %v1959_v56  ;;  %v2598_v3 = vor.u32 %v3002_v61, %v2597_v60  ;;  %v1946_v15 = vor.u32 %v2836_v4, %v1943_v5  ;;  %v2663_v54 = vld [vmem:[%s4456_s1 + $0x5d8] sm:$0xf0]  ;;  %v2936_v34 = vld [vmem:[%s4456_s1 + $0x34c] sm:$0xf] }
  0x8a   :  { %1428 = vmatmul.bf16.vlgmr.msra.gmra.mxu3 %v3374_v7  ;;  %v2391_v61 = vld [vmem:[%s4456_s1 + $0x3b8] sm:$0xf0] }
  0x8b   :  { %1472 = vmatpush.bf16.msrb.mxu3 %v2678_v0  ;;  %1454 = vmatmul.bf16.vlgmr.msra.gmra.mxu2 %v3343_v57  ;;  %v2872_v0 = vld [vmem:[%s4456_s1 + $0x14c] sm:$0xf]  ;;  %v2647_v4 = vld [vmem:[%s4456_s1 + $0x5b8] sm:$0xf0] }
  0x8c   :  { %1498 = vmatpush.bf16.msrb.mxu2 %v2042_v63  ;;  %1512 = vmatpush.bf16.msrb.mxu0 %v2154_v17  ;;  %v2966_v63 = vld [vmem:[%s4456_s1 + $0x434] sm:$0xf0]  ;;  %v2090_v8 = vor.u32 %v2872_v0, %v2087_v1  ;;  %v2295_v17 = vld [vmem:[%s4456_s1 + $0x2f8] sm:$0xf0]  ;;  %v2912_v1 = vld [vmem:[%s4456_s1 + $0x28c] sm:$0xf] }
  0x8d   :  { %1461 = vmatpush.bf16.msra.mxu1 %v2518_v16  ;;  %v2454_v6 = vor.u32 %v2966_v63, %v2453_v62  ;;  %v2924_v16 = vld [vmem:[%s4456_s1 + $0x2ec] sm:$0xf]  ;;  %v2519_v63 = vld [vmem:[%s4456_s1 + $0x4b8] sm:$0xf0] }
  0x8e   :  { %v2298_v27 = vor.u32 %v2924_v16, %v2295_v17  ;;  %v2980_v62 = vld [vmem:[%s4456_s1 + $0x4ac] sm:$0xf] }
  0x8f   :  { %1473 = vmatpush.bf16.msrb.mxu3 %v2662_v13  ;;  %v2868_v13 = vld [vmem:[%s4456_s1 + $0x12c] sm:$0xf] }
  0x90   :  { %1499 = vmatpush.bf16.msrb.mxu2 %v2026_v12  ;;  %1513 = vmatpush.bf16.msrb.mxu0 %v2138_v29  ;;  %v2962_v12 = vld [vmem:[%s4456_s1 + $0x414] sm:$0xf0]  ;;  %v2074_v23 = vor.u32 %v2868_v13, %v2071_v14  ;;  %v2551_v29 = vld [vmem:[%s4456_s1 + $0x4f8] sm:$0xf0]  ;;  %v2908_v13 = vld [vmem:[%s4456_s1 + $0x26c] sm:$0xf] }
  0x91   :  { %1462 = vmatpush.bf16.msra.mxu1 %v2502_v28  ;;  %v2438_v22 = vor.u32 %v2962_v12, %v2437_v11  ;;  %v2988_v28 = vld [vmem:[%s4456_s1 + $0x4ec] sm:$0xf]  ;;  %v2503_v11 = vld [vmem:[%s4456_s1 + $0x498] sm:$0xf0] }
  0x92   :  { %v2554_v41 = vor.u32 %v2988_v28, %v2551_v29  ;;  %v2231_v14 = vld [vmem:[%s4456_s1 + $0x278] sm:$0xf0]  ;;  %v3008_v16 = vld [vmem:[%s4456_s1 + $0x58c] sm:$0xf] }
  0x93   :  { %1474 = vmatpush.bf16.msrb.mxu3 %v2646_v25  ;;  %2701 = vmatmul.msk.bf16.vlgmr.msra.gmra.mxu0 %vm1221_vm0, %v3453_v45  ;;  %v2956_v25 = vld [vmem:[%s4456_s1 + $0x3ec] sm:$0xf]  ;;  %v2234_v20 = vor.u32 %v2908_v13, %v2231_v14  ;;  %v2615_v29 = vld [vmem:[%s4456_s1 + $0x578] sm:$0xf0] }
  0x94   :  { %1500 = vmatpush.bf16.msrb.mxu2 %v2010_v24  ;;  %1514 = vmatpush.bf16.msrb.mxu0 %v2122_v43  ;;  %v2994_v24 = vld [vmem:[%s4456_s1 + $0x514] sm:$0xf0]  ;;  %v2426_v40 = vor.u32 %v2956_v25, %v2423_v26  ;;  %v2282_v43 = vor.u32 %v2920_v31, %v2279_v33  ;;  %v2904_v26 = vld [vmem:[%s4456_s1 + $0x24c] sm:$0xf] }
  0x95   :  { %1463 = vmatpush.bf16.msra.mxu1 %v2486_v42  ;;  %v2566_v37 = vor.u32 %v2994_v24, %v2565_v19  ;;  %v2952_v42 = vld [vmem:[%s4456_s1 + $0x3cc] sm:$0xf] }
  0x96   :  { %v2410_v56 = vor.u32 %v2952_v42, %v2407_v46  ;;  %v2940_v19 = vld [vmem:[%s4456_s1 + $0x36c] sm:$0xf] }
  0x97   :  { %1475 = vmatpush.bf16.msrb.mxu3 %v2630_v39  ;;  %v2679_v39 = vld [vmem:[%s4456_s1 + $0x5f8] sm:$0xf0]  ;;  %v3004_v28 = vld [vmem:[%s4456_s1 + $0x56c] sm:$0xf] }
  0x98   :  { %1501 = vmatpush.bf16.msrb.mxu2 %v1994_v38  ;;  %1515 = vmatpush.bf16.msrb.mxu0 %v2106_v59  ;;  %v3020_v38 = vld [vmem:[%s4456_s1 + $0x5ec] sm:$0xf] }
  0x99   :  { %1464 = vmatpush.bf16.msra.mxu1 %v2470_v58  ;;  %v2682_v49 = vor.u32 %v3020_v38, %v2679_v39  ;;  %v2538_v58 = vor.u32 %v2984_v47, %v2535_v48  ;;  %v2948_v59 = vld [vmem:[%s4456_s1 + $0x3ac] sm:$0xf]  ;;  %v2343_v38 = vld [vmem:[%s4456_s1 + $0x358] sm:$0xf0] }
  0x9a   :  { %v2394_v5 = vor.u32 %v2948_v59, %v2391_v61  ;;  %v2968_v39 = vld [vmem:[%s4456_s1 + $0x44c] sm:$0xf]  ;;  %v2599_v47 = vld [vmem:[%s4456_s1 + $0x558] sm:$0xf0]  ;;  %v2346_v48 = vor.u32 %v2936_v34, %v2343_v38 }
  0x9b   :  { %1476 = vmatpush.bf16.msrb.mxu3 %v2614_v53  ;;  %v3016_v53 = vld [vmem:[%s4456_s1 + $0x5cc] sm:$0xf] }
  0x9c   :  { %1502 = vmatpush.bf16.msrb.mxu2 %v1978_v52  ;;  %1516 = vmatpush.bf16.msrb.mxu0 %v2090_v8  ;;  %v2263_v52 = vld [vmem:[%s4456_s1 + $0x2b8] sm:$0xf0]  ;;  %v2666_v0 = vor.u32 %v3016_v53, %v2663_v54  ;;  %v2944_v8 = vld [vmem:[%s4456_s1 + $0x38c] sm:$0xf] }
  0x9d   :  { %1465 = vmatpush.bf16.msra.mxu1 %v2454_v6  ;;  %v2266_v60 = vor.u32 %v2916_v50, %v2263_v52  ;;  %v2522_v6 = vor.u32 %v2980_v62, %v2519_v63  ;;  %v2900_v42 = vld [vmem:[%s4456_s1 + $0x22c] sm:$0xf]  ;;  %v2327_v53 = vld [vmem:[%s4456_s1 + $0x338] sm:$0xf0] }
  0x9e   :  { %v3000_v46 = vld [vmem:[%s4456_s1 + $0x54c] sm:$0xf]  ;;  %v2583_v63 = vld [vmem:[%s4456_s1 + $0x538] sm:$0xf0] }
  0x9f   :  { %1477 = vmatpush.bf16.msrb.mxu3 %v2598_v3  ;;  %v3012_v3 = vld [vmem:[%s4456_s1 + $0x5ac] sm:$0xf] }
  0xa0   :  { %1503 = vmatpush.bf16.msrb.mxu2 %v1962_v2  ;;  %1517 = vmatpush.bf16.msrb.mxu0 %v2074_v23  ;;  %v2247_v2 = vld [vmem:[%s4456_s1 + $0x298] sm:$0xf0]  ;;  %v2650_v12 = vor.u32 %v3012_v3, %v2647_v4  ;;  %v2932_v50 = vld [vmem:[%s4456_s1 + $0x32c] sm:$0xf] }
  0xa1   :  { %1466 = vmatpush.bf16.msra.mxu1 %v2438_v22  ;;  %v2250_v9 = vor.u32 %v2912_v1, %v2247_v2  ;;  %v2972_v22 = vld [vmem:[%s4456_s1 + $0x46c] sm:$0xf]  ;;  %v2487_v23 = vld [vmem:[%s4456_s1 + $0x478] sm:$0xf0]  ;;  %v4245_v25 = vpop.f32.mrf.mxu1  ;;  %v2330_v3 = vor.u32 %v2932_v50, %v2327_v53 }
  0xa2   :  { %v2490_v33 = vor.u32 %v2972_v22, %v2487_v23  ;;  %v2964_v54 = vld [vmem:[%s4456_s1 + $0x42c] sm:$0xf]  ;;  %v2695_v1 = vld [vmem:[%s4456_s1 + $0x618] sm:$0xf0] }
  0xa3   :  { %1478 = vmatpush.bf16.msrb.mxu3 %v2582_v18  ;;  %v2506_v18 = vor.u32 %v2976_v10, %v2503_v11  ;;  %v2896_v59 = vld [vmem:[%s4456_s1 + $0x20c] sm:$0xf]  ;;  %v3042_v23 = vld [vmem:[%s4459_s3 + $0x78] sm:$0xff] }
  0xa4   :  { %1504 = vmatpush.bf16.msrb.mxu2 %v1946_v15  ;;  %1467 = vmatmul.bf16.vlgmr.msra.gmra.mxu1 %v3544_v30  ;;  %v4225_v15 = vpop.f32.mrf.mxu0  ;;  %v2996_v61 = vld [vmem:[%s4456_s1 + $0x52c] sm:$0xf] }
  0xa5   :  { %1524 = vmatpush.bf16.msrb.mxu1 %v2298_v27  ;;  %1518 = vmatpush.bf16.msrb.mxu0 %v2058_v44  ;;  %v2215_v27 = vld [vmem:[%s4456_s1 + $0x258] sm:$0xf0]  ;;  %v2586_v10 = vor.u32 %v2996_v61, %v2583_v63  ;;  %v2960_v11 = vld [vmem:[%s4456_s1 + $0x40c] sm:$0xf] }
  0xa6   :  { %v2218_v36 = vor.u32 %v2904_v26, %v2215_v27  ;;  %v2992_v14 = vld [vmem:[%s4456_s1 + $0x50c] sm:$0xf]  ;;  %v3041_v27 = vld [vmem:[%s4459_s3 + $0x70] sm:$0xff] }
  0xa7   :  { %1479 = vmatpush.bf16.msrb.mxu3 %v2566_v37 }
  0xa8   :  { %1505 = vmatpush.bf16.msrb.mxu2 %v1930_v32  ;;  %1519 = vmatmul.bf16.vlgmr.msrb.gmra.mxu0 %v3374_v7  ;;  %v2631_v7 = vld [vmem:[%s4456_s1 + $0x598] sm:$0xf0]  ;;  %v2362_v32 = vor.u32 %v2940_v19, %v2359_v21 }
  0xa9   :  { %1525 = vmatpush.bf16.msrb.mxu1 %v2282_v43  ;;  %1563 = vmatpush.bf16.msra.mxu0 %v2682_v49  ;;  %v2634_v24 = vor.u32 %v3008_v16, %v2631_v7  ;;  %v4259_v31 = vpop.f32.mrf.mxu2  ;;  %v4264_v37 = vpop.f32.mrf.mxu3  ;;  %v2199_v43 = vld [vmem:[%s4456_s1 + $0x238] sm:$0xf0] }
  0xaa   :  { %1480 = vmatmul.bf16.vlgmr.msrb.gmra.mxu3 %v3555_v35  ;;  %v2202_v52 = vor.u32 %v2900_v42, %v2199_v43  ;;  %v1249_v62 = vpop.f32.mrf.mxu1  ;;  %v2567_v16 = vld [vmem:[%s4456_s1 + $0x518] sm:$0xf0]  ;;  %v3028_v42 = vld [vmem:[%s4459_s3 + $0x8] sm:$0xff] }
  0xab   :  { %1537 = vmatpush.bf16.msra.mxu3 %v2426_v40  ;;  %1506 = vmatmul.bf16.vlgmr.msrb.gmra.mxu2 %v3341_v55  ;;  %v2375_v55 = vld [vmem:[%s4456_s1 + $0x398] sm:$0xf0] }
  0xac   :  { %1550 = vmatpush.bf16.msra.mxu2 %v2554_v41  ;;  %v2378_v17 = vor.u32 %v2944_v8, %v2375_v55  ;;  %v2471_v40 = vld [vmem:[%s4456_s1 + $0x458] sm:$0xf0]  ;;  %v2618_v41 = vor.u32 %v3004_v28, %v2615_v29  ;;  %v1236_v44 = vpop.f32.mrf.mxu0  ;;  %v2928_v8 = vld [vmem:[%s4456_s1 + $0x30c] sm:$0xf] }
  0xad   :  { %1526 = vmatpush.bf16.msrb.mxu1 %v2266_v60  ;;  %1564 = vmatpush.bf16.msra.mxu0 %v2666_v0  ;;  %v2474_v49 = vor.u32 %v2968_v39, %v2471_v40  ;;  %v2183_v60 = vld [vmem:[%s4456_s1 + $0x218] sm:$0xf0]  ;;  %v3024_v0 = vld [vmem:[%s4456_s1 + $0x60c] sm:$0xf] }
  0xae   :  { %v2698_v13 = vor.u32 %v3024_v0, %v2695_v1  ;;  %v3034_v19 = vld [vmem:[%s4459_s3 + $0x38] sm:$0xff] }
  0xaf   :  { %1538 = vmatpush.bf16.msra.mxu3 %v2410_v56  ;;  %v2455_v56 = vld [vmem:[%s4456_s1 + $0x438] sm:$0xf0] }
  0xb0   :  { %1551 = vmatpush.bf16.msra.mxu2 %v2538_v58  ;;  %v2602_v58 = vor.u32 %v3000_v46, %v2599_v47  ;;  %v2458_v4 = vor.u32 %v2964_v54, %v2455_v56  ;;  %v3027_v46 = vld [vmem:[%s4459_s3] sm:$0xff]  ;;  %v3050_v1 = vld [vmem:[%s4459_s3 + $0xb8] sm:$0xff] }
  0xb1   :  { %1527 = vmatpush.bf16.msrb.mxu1 %v2250_v9  ;;  %1565 = vmatpush.bf16.msra.mxu0 %v2650_v12  ;;  %v1262_v2 = vpop.f32.mrf.mxu2  ;;  %v2311_v9 = vld [vmem:[%s4456_s1 + $0x318] sm:$0xf0]  ;;  %v1275_v55 = vpop.f32.mrf.mxu3 }
  0xb2   :  { %v2439_v12 = vld [vmem:[%s4456_s1 + $0x418] sm:$0xf0]  ;;  %v3049_v2 = vld [vmem:[%s4459_s3 + $0xb0] sm:$0xff] }
  0xb3   :  { %1539 = vmatpush.bf16.msra.mxu3 %v2394_v5  ;;  %v4320_v5 = vld [vmem:[%s4458_s2] sm:$0xf] }
  0xb4   :  { %1552 = vmatpush.bf16.msra.mxu2 %v2522_v6  ;;  %v2186_v6 = vor.u32 %v2896_v59, %v2183_v60  ;;  %v233_v7 = vperm.slane %v4320_v5, 0  ;;  %v234_v54 = vperm.slane %v4320_v5, 1 }
  0xb5   :  { %1528 = vmatpush.bf16.msrb.mxu1 %v2234_v20  ;;  %1566 = vmatpush.bf16.msra.mxu0 %v2634_v24  ;;  %v2570_v20 = vor.u32 %v2992_v14, %v2567_v16  ;;  %v3033_v24 = vld [vmem:[%s4459_s3 + $0x30] sm:$0xff]  ;;  %v3046_v16 = vld [vmem:[%s4459_s3 + $0x98] sm:$0xff] }
  0xb6   :  { %v1235_v21 = vadd.f32 %v4225_v15, %v233_v7  ;;  %v3045_v7 = vld [vmem:[%s4459_s3 + $0x90] sm:$0xff] }
  0xb7   :  { %1540 = vmatpush.bf16.msra.mxu3 %v2378_v17  ;;  %v2314_v17 = vor.u32 %v2928_v8, %v2311_v9  ;;  %v3048_v9 = vld [vmem:[%s4459_s3 + $0xa8] sm:$0xff] }
  0xb8   :  { %1553 = vmatpush.bf16.msra.mxu2 %v2506_v18  ;;  %v2442_v18 = vor.u32 %v2960_v11, %v2439_v12  ;;  %v1248_v15 = vadd.f32 %v4245_v25, %v1235_v21 }
  0xb9   :  { %1529 = vmatpush.bf16.msrb.mxu1 %v2218_v36  ;;  %1567 = vmatpush.bf16.msra.mxu0 %v2618_v41  ;;  %v1312_v22 = vpop.f32.mrf.mxu2  ;;  %v3039_v36 = vld [vmem:[%s4459_s3 + $0x60] sm:$0xff]  ;;  %v3038_v41 = vld [vmem:[%s4459_s3 + $0x58] sm:$0xff] }
  0xba   :  { %v1261_v28 = vadd.f32 %v4259_v31, %v1248_v15  ;;  %v3043_v15 = vld [vmem:[%s4459_s3 + $0x80] sm:$0xff] }
  0xbb   :  { %1541 = vmatpush.bf16.msra.mxu3 %v2362_v32  ;;  %v3030_v32 = vld [vmem:[%s4459_s3 + $0x18] sm:$0xff] }
  0xbc   :  { %1554 = vmatpush.bf16.msra.mxu2 %v2490_v33  ;;  %v1274_v25 = vadd.f32 %v4264_v37, %v1261_v28  ;;  %v3029_v37 = vld [vmem:[%s4459_s3 + $0x10] sm:$0xff] }
  0xbd   :  { %1530 = vmatpush.bf16.msrb.mxu1 %v2202_v52  ;;  %1568 = vmatpush.bf16.msra.mxu0 %v2602_v58  ;;  %v3035_v52 = vld [vmem:[%s4459_s3 + $0x40] sm:$0xff]  ;;  %v3057_v28 = vld [vmem:[%s4459_s3 + $0xf0] sm:$0xff] }
  0xbf   :  { %1542 = vmatpush.bf16.msra.mxu3 %v2346_v48 }
  0xc0   :  { %1555 = vmatpush.bf16.msra.mxu2 %v2474_v49  ;;  %v1286_v26 = vpop.f32.mrf.mxu0  ;;  %v3036_v49 = vld [vmem:[%s4459_s3 + $0x48] sm:$0xff] }
  0xc1   :  { %1531 = vmatpush.bf16.msrb.mxu1 %v2186_v6  ;;  %1569 = vmatpush.bf16.msra.mxu0 %v2586_v10  ;;  %v1287_v31 = vadd.f32 %v1286_v26, %v1274_v25  ;;  %v3047_v10 = vld [vmem:[%s4459_s3 + $0xa0] sm:$0xff]  ;;  %v3056_v25 = vld [vmem:[%s4459_s3 + $0xe8] sm:$0xff] }
  0xc3   :  { %1543 = vmatpush.bf16.msra.mxu3 %v2330_v3  ;;  %v1299_v29 = vpop.f32.mrf.mxu1 }
  0xc4   :  { %1556 = vmatpush.bf16.msra.mxu2 %v2458_v4  ;;  %1532 = vmatmul.bf16.vlgmr.msrb.gmra.mxu1 %v3330_v51  ;;  %v3032_v51 = vld [vmem:[%s4459_s3 + $0x28] sm:$0xff]  ;;  %v1300_v40 = vadd.f32 %v1299_v29, %v1287_v31  ;;  %v235_v29 = vperm.slane %v4320_v5, 2  ;;  %v3055_v31 = vld [vmem:[%s4459_s3 + $0xe0] sm:$0xff] }
  0xc5   :  { %1583 = vmatpush.bf16.msra.mxu1 %v2698_v13  ;;  %1570 = vmatpush.bf16.msra.mxu0 %v2570_v20  ;;  %v3044_v20 = vld [vmem:[%s4459_s3 + $0x88] sm:$0xff] }
  0xc6   :  { %v1313_v43 = vadd.f32 %v1312_v22, %v1300_v40 }
  0xc7   :  { %1544 = vmatpush.bf16.msra.mxu3 %v2314_v17 }
  0xc8   :  { %1557 = vmatpush.bf16.msra.mxu2 %v2442_v18  ;;  %1571 = vmatmul.bf16.vlgmr.msra.gmra.mxu0 %v3555_v35  ;;  %v3040_v35 = vld [vmem:[%s4459_s3 + $0x68] sm:$0xff]  ;;  %v1288_v34 = vpop.f32.mrf.mxu0  ;;  %v1589_v48 = vmax.f32 %v1313_v43, 0.0 }
  0xc9   :  { %1870 = vmatpush.bf16.msrb.mxu1 %v3042_v23  ;;  %v1325_v33 = vpop.f32.mrf.mxu3 }
  0xca   :  { %1545 = vmatmul.bf16.vlgmr.msra.gmra.mxu3 %v3343_v57  ;;  %v1314_v57 = vpop.f32.mrf.mxu2  ;;  %v1593_v50 = vpack.c.bf16 %v1589_v48, %v1589_v48  ;;  %v1326_v58 = vadd.f32 %v1325_v33, %v234_v54  ;;  %v236_v54 = vperm.slane %v4320_v5, 3 }
  0xcb   :  { %1857 = vmatpush.bf16.msrb.mxu3 %v3034_v19  ;;  %1558 = vmatmul.bf16.vlgmr.msra.gmra.mxu2 %v3544_v30  ;;  %v3031_v30 = vld [vmem:[%s4459_s3 + $0x20] sm:$0xff]  ;;  %v1301_v38 = vpop.f32.mrf.mxu1 }
  0xcc   :  { %1883 = vmatpush.bf16.msrb.mxu2 %v3050_v1 }
  0xcd   :  { %1871 = vmatpush.bf16.msrb.mxu1 %v3041_v27 }
  0xcf   :  { %1858 = vmatpush.bf16.msrb.mxu3 %v3033_v24 }
  0xd0   :  { %1884 = vmatpush.bf16.msrb.mxu2 %v3049_v2 }
  0xd1   :  { %1872 = vmatpush.bf16.msrb.mxu1 %v3040_v35  ;;  %v1327_v44 = vpop.f32.mrf.mxu3 }
  0xd2   :  { %v1338_v39 = vpop.f32.mrf.mxu2 }
  0xd3   :  { %1859 = vmatpush.bf16.msrb.mxu3 %v3032_v51  ;;  %v1339_v62 = vadd.f32 %v1338_v39, %v1326_v58  ;;  %v3058_v51 = vld [vmem:[%s4459_s3 + $0xf8] sm:$0xff] }
  0xd4   :  { %2702 = vmatmul.msk.bf16.vlgmr.msra.gmra.mxu1 %vm1221_vm0, %v3453_v45  ;;  %v3037_v45 = vld [vmem:[%s4459_s3 + $0x50] sm:$0xff]  ;;  %1885 = vmatpush.bf16.msrb.mxu2 %v3048_v9 }
  0xd5   :  { %1873 = vmatpush.bf16.msrb.mxu1 %v3039_v36  ;;  %1896 = vmatpush.bf16.msrb.mxu0 %v3058_v51  ;;  %v3054_v36 = vld [vmem:[%s4459_s3 + $0xd8] sm:$0xff] }
  0xd7   :  { %1860 = vmatpush.bf16.msrb.mxu3 %v3031_v30 }
  0xd8   :  { %1886 = vmatpush.bf16.msrb.mxu2 %v3047_v10 }
  0xd9   :  { %1874 = vmatpush.bf16.msrb.mxu1 %v3038_v41  ;;  %1897 = vmatpush.bf16.msrb.mxu0 %v3057_v28  ;;  %v3053_v41 = vld [vmem:[%s4459_s3 + $0xd0] sm:$0xff] }
  0xda   :  { %v1340_v47 = vpop.f32.mrf.mxu2 }
  0xdb   :  { %1861 = vmatpush.bf16.msrb.mxu3 %v3030_v32 }
  0xdc   :  { %1887 = vmatpush.bf16.msrb.mxu2 %v3046_v16 }
  0xdd   :  { %1875 = vmatpush.bf16.msrb.mxu1 %v3037_v45  ;;  %1898 = vmatpush.bf16.msrb.mxu0 %v3056_v25 }
  0xdf   :  { %1862 = vmatpush.bf16.msrb.mxu3 %v3029_v37 }
  0xe0   :  { %v1351_v53 = vpop.f32.mrf.mxu0  ;;  %1888 = vmatpush.bf16.msrb.mxu2 %v3045_v7 }
  0xe1   :  { %1876 = vmatpush.bf16.msrb.mxu1 %v3036_v49  ;;  %v1352_v0 = vadd.f32 %v1351_v53, %v1339_v62  ;;  %1899 = vmatpush.bf16.msrb.mxu0 %v3055_v31 }
  0xe3   :  { %1863 = vmatpush.bf16.msrb.mxu3 %v3028_v42  ;;  %v1364_v56 = vpop.f32.mrf.mxu1 }
  0xe4   :  { %v1365_v4 = vadd.f32 %v1364_v56, %v1352_v0  ;;  %1889 = vmatpush.bf16.msrb.mxu2 %v3044_v20 }
  0xe5   :  { %1877 = vmatpush.bf16.msrb.mxu1 %v3035_v52  ;;  %1900 = vmatpush.bf16.msrb.mxu0 %v3054_v36 }
  0xe7   :  { %1864 = vmatpush.bf16.msrb.mxu3 %v3027_v46  ;;  %v3052_v46 = vld [vmem:[%s4459_s3 + $0xc8] sm:$0xff] }
  0xe8   :  { %v1353_v60 = vpop.f32.mrf.mxu0  ;;  %1890 = vmatpush.bf16.msrb.mxu2 %v3043_v15 }
  0xe9   :  { %v1377_v59 = vpop.f32.mrf.mxu3  ;;  %1901 = vmatpush.bf16.msrb.mxu0 %v3053_v41 }
  0xea   :  { %1865 = vmatmul.bf16.vlgmr.msrb.gmra.mxu3 %v1593_v50  ;;  %v1378_v8 = vadd.f32 %v1377_v59, %v1365_v4  ;;  %v3051_v50 = vld [vmem:[%s4459_s3 + $0xc0] sm:$0xff] }
  0xeb   :  { %v1366_v63 = vpop.f32.mrf.mxu1 }
  0xed   :  { %1902 = vmatpush.bf16.msrb.mxu0 %v3052_v46 }
  0xee   :  { %v1390_v61 = vpop.f32.mrf.mxu2 }
  0xef   :  { %v1391_v55 = vadd.f32 %v1390_v61, %v1378_v8 }
  0xf1   :  { %v1379_v3 = vpop.f32.mrf.mxu3  ;;  %1903 = vmatpush.bf16.msrb.mxu0 %v3051_v50 }
  0xf6   :  { %v1392_v6 = vpop.f32.mrf.mxu2 }
  0xf9   :  { %v1403_v11 = vpop.f32.mrf.mxu3 }
  0xfa   :  { %v1404_v12 = vadd.f32 %v1403_v11, %v1391_v55 }
  0xfc   :  { %v1590_v13 = vmax.f32 %v1404_v12, 0.0 }
  0xfe   :  { %v1594_v14 = vpack.c.bf16 %v1590_v13, %v1590_v13 }
 0x100   :  { %1878 = vmatmul.bf16.vlgmr.msrb.gmra.mxu1 %v1594_v14  ;;  %v1442_v18 = vpop.f32.mrf.mxu0  ;;  %v3059_v14 = vld [vmem:[%s4460_s4] ss:$0 sm:$0xff] }
 0x101   :  { %v1405_v17 = vpop.f32.mrf.mxu3 }
 0x103   :  { %v1416_v19 = vpop.f32.mrf.mxu1 }
 0x104   :  { %v1417_v30 = vadd.f32 %v1416_v19, %v235_v29 }
 0x108   :  { %v1444_v22 = vpop.f32.mrf.mxu0 }
 0x10b   :  { %v1418_v24 = vpop.f32.mrf.mxu1 }
 0x10d   :  { %v1429_v21 = vpop.f32.mrf.mxu3 }
 0x10e   :  { %v1455_v23 = vpop.f32.mrf.mxu2  ;;  %v1430_v32 = vadd.f32 %v1429_v21, %v1417_v30 }
 0x110   :  { %v1494_v27 = vpop.f32.mrf.mxu0  ;;  %v1443_v34 = vadd.f32 %v1442_v18, %v1430_v32 }
 0x112   :  { %v1456_v38 = vadd.f32 %v1455_v23, %v1443_v34 }
 0x115   :  { %v1431_v26 = vpop.f32.mrf.mxu3 }
 0x116   :  { %v1457_v57 = vpop.f32.mrf.mxu2 }
 0x118   :  { %v1496_v35 = vpop.f32.mrf.mxu0 }
 0x121   :  { %v1468_v33 = vpop.f32.mrf.mxu1 }
 0x122   :  { %v1469_v39 = vadd.f32 %v1468_v33, %v1456_v38 }
 0x125   :  { %v1520_v37 = vpop.f32.mrf.mxu0 }
 0x129   :  { %v1470_v40 = vpop.f32.mrf.mxu1 }
 0x12d   :  { %v1481_v42 = vpop.f32.mrf.mxu3  ;;  %v1522_v48 = vpop.f32.mrf.mxu0 }
 0x12e   :  { %v1482_v45 = vadd.f32 %v1481_v42, %v1469_v39  ;;  %v1507_v43 = vpop.f32.mrf.mxu2 }
 0x12f   :  { %v1508_v56 = vadd.f32 %v1507_v43, %v236_v54 }
 0x130   :  { %v1495_v44 = vadd.f32 %v1494_v27, %v1482_v45 }
 0x131   :  { %v1521_v59 = vadd.f32 %v1520_v37, %v1508_v56 }
 0x132   :  { %v1591_v47 = vmax.f32 %v1495_v44, 0.0 }
 0x134   :  { %v1595_v49 = vpack.c.bf16 %v1591_v47, %v1591_v47 }
 0x135   :  { %v1483_v52 = vpop.f32.mrf.mxu3 }
 0x136   :  { %1891 = vmatmul.bf16.vlgmr.msrb.gmra.mxu2 %v1595_v49  ;;  %v1509_v53 = vpop.f32.mrf.mxu2 }
 0x141   :  { %v1533_v58 = vpop.f32.mrf.mxu1 }
 0x142   :  { %v1534_v61 = vadd.f32 %v1533_v58, %v1521_v59 }
 0x145   :  { %v1572_v60 = vpop.f32.mrf.mxu0 }
 0x149   :  { %v1535_v62 = vpop.f32.mrf.mxu1 }
 0x14d   :  { %v1546_v63 = vpop.f32.mrf.mxu3  ;;  %v1574_v3 = vpop.f32.mrf.mxu0 }
 0x14e   :  { %v1547_v0 = vadd.f32 %v1546_v63, %v1534_v61  ;;  %v1559_v1 = vpop.f32.mrf.mxu2 }
 0x150   :  { %v1560_v2 = vadd.f32 %v1559_v1, %v1547_v0 }
 0x151   :  { %v1585_v6 = vpop.f32.mrf.mxu1 }
 0x152   :  { %v1573_v4 = vadd.f32 %v1572_v60, %v1560_v2 }
 0x154   :  { %v1586_v8 = vadd.f32 %v1585_v6, %v1573_v4 }
 0x155   :  { %v1548_v9 = vpop.f32.mrf.mxu3 }
 0x156   :  { %v1561_v55 = vpop.f32.mrf.mxu2  ;;  %v1592_v10 = vmax.f32 %v1586_v8, 0.0 }
 0x158   :  { %v1596_v11 = vpack.c.bf16 %v1592_v10, %v1592_v10 }
 0x159   :  { %v1587_v5 = vpop.f32.mrf.mxu1 }
 0x15a   :  { %1904 = vmatmul.bf16.vlgmr.msrb.gmra.mxu0 %v1596_v11 }
 0x16d   :  { %v1866_v12 = vpop.f32.mrf.mxu3 }
 0x16e   :  { %v1867_v16 = vadd.f32 %v3059_v14, %v1866_v12 }
 0x175   :  { %v1868_v13 = vpop.f32.mrf.mxu3 }
 0x17d   :  { %v1879_v7 = vpop.f32.mrf.mxu1 }
 0x17e   :  { %v1880_v17 = vadd.f32 %v1879_v7, %v1867_v16 }
 0x185   :  { %v1881_v18 = vpop.f32.mrf.mxu1 }
 0x1b9   :  { %v1892_v19 = vpop.f32.mrf.mxu2 }
 0x1ba   :  { %v1893_v21 = vadd.f32 %v1892_v19, %v1880_v17 }
 0x1c1   :  { %v1894_v20 = vpop.f32.mrf.mxu2 }
 0x1d7   :  { %v1905_v22 = vpop.f32.mrf.mxu0 }
 0x1d8   :  { %v1906_v23 = vadd.f32 %v1905_v22, %v1893_v21 }
 0x1da   :  { %v1909_v24 = vpack.c.bf16 %v1906_v23, %v1906_v23 }
 0x1dc   :  { %1910 = vst [vmem:[%s4461_s5] sm:$0xf] %v1909_v24 }
 0x1df   :  { %v1907_v15 = vpop.f32.mrf.mxu0 }

</bundles_post_ra>
